<compile_context>
chip_gen: v7x
topology: tpu7x:2x2x1
jax: 0.10.0
libtpu: 0.0.40
codegen_flags: <defaults>
</compile_context>

<pallas_src>
import functools
import math

import jax
import jax.numpy as jnp
from jax import lax
from jax.experimental import pallas as pl
from jax.experimental.pallas import tpu as pltpu

# ----------------------- small synthetic BERT config -----------------------
VOCAB = 128
B = 2          # batch (number of sentences)
S = 8          # max sequence length (after padding/truncation)
H = 32         # hidden size
NUM_HEADS = 2
HEAD_DIM = H // NUM_HEADS
FFN = 64       # intermediate size
LAYERS = 2
LN_EPS = 1e-12
H3 = 3 * H     # width of the packed QKV weights / packed vector slab (>= FFN)


# ------------------------------ kernel helpers ------------------------------
def _layernorm(x, gamma, beta, eps=LN_EPS):
    mean = jnp.mean(x, axis=-1, keepdims=True)
    var = jnp.mean((x - mean) ** 2, axis=-1, keepdims=True)
    return (x - mean) * lax.rsqrt(var + eps) * gamma + beta


# --------------------------- fused forward kernel ----------------------------
def fused_forward_kernel(len_ref, emb_ref, embln_ref,
                         wqkv_ref, wo_ref, w1_ref, w2_ref, vecs_ref,
                         out_ref, *, pooling):
    # len_ref:   SMEM (B,) int32   true (unpadded) token count per sentence
    # emb_ref:   VMEM (B*S, H)     tok + pos + type embeddings (pre-LayerNorm)
    # embln_ref: VMEM (2, H)       embedding LN gamma / beta
    # wqkv_ref:  (L, H, 3H)  wo_ref: (L, H, H)  w1_ref: (L, H, FFN)  w2_ref: (L, FFN, H)
    # vecs_ref:  (L, 8, 3H)        packed bias / LN vectors (see pack_params)
    # out_ref:   VMEM (B, H)       pooled sentence embeddings

    x = _layernorm(emb_ref[...], embln_ref[0:1, :], embln_ref[1:2, :])   # (B*S, H)

    # Additive key-mask bias per sentence, built in-register from scalar lengths.
    col = lax.broadcasted_iota(jnp.int32, (1, S), 1)                     # (1, S)
    neg_bias = [jnp.where(col < len_ref[b], 0.0, -1e9).astype(jnp.float32)
                for b in range(B)]

    scale = 1.0 / math.sqrt(HEAD_DIM)

    for l in range(LAYERS):            # static unroll (LAYERS = 2)
        wqkv = wqkv_ref[l]             # (H, 3H)
        wo = wo_ref[l]                 # (H, H)
        w1 = w1_ref[l]                 # (H, FFN)
        w2 = w2_ref[l]                 # (FFN, H)
        vecs = vecs_ref[l]             # (8, 3H)
        bqkv = vecs[0:1, :]            # (1, 3H)
        bo = vecs[1:2, :H]
        ln1_g, ln1_b = vecs[2:3, :H], vecs[3:4, :H]
        b1 = vecs[4:5, :FFN]
        b2 = vecs[5:6, :H]
        ln2_g, ln2_b = vecs[6:7, :H], vecs[7:8, :H]

        # Fused QKV projection over all B*S tokens at once.
        qkv = jnp.dot(x, wqkv, preferred_element_type=jnp.float32) + bqkv  # (B*S, 3H)

        # Self-attention: static loops over sentences (B=2) and heads (2).
        # Wo is applied per head and summed, so no lane-wise concatenate is needed.
        attn_rows = []
        for b in range(B):
            r0, r1 = b * S, (b + 1) * S
            attn_b = jnp.zeros((S, H), jnp.float32)
            for h in range(NUM_HEADS):
                c = h * HEAD_DIM
                qh = qkv[r0:r1, c:c + HEAD_DIM]
                kh = qkv[r0:r1, H + c:H + c + HEAD_DIM]
                vh = qkv[r0:r1, 2 * H + c:2 * H + c + HEAD_DIM]
                s = lax.dot_general(qh, kh, (((1,), (1,)), ((), ())),
                                    preferred_element_type=jnp.float32)    # (S, S)
                s = s * scale + neg_bias[b]
                s = s - jnp.max(s, axis=-1, keepdims=True)
                p = jnp.exp(s)
                p = p * pl.reciprocal(jnp.sum(p, axis=-1, keepdims=True), approx=True)
                ctx = jnp.dot(p, vh, preferred_element_type=jnp.float32)   # (S, HEAD_DIM)
                attn_b = attn_b + jnp.dot(ctx, wo[c:c + HEAD_DIM, :],
                                          preferred_element_type=jnp.float32)
            attn_rows.append(attn_b)
        attn_out = jnp.concatenate(attn_rows, axis=0) + bo   # sublane concat -> (B*S, H)

        h1 = _layernorm(x + attn_out, ln1_g, ln1_b)

        ff = jnp.dot(h1, w1, preferred_element_type=jnp.float32) + b1
        # TODO(synk): HF BERT uses exact erf GELU; tanh approximation used here for
        # guaranteed Mosaic lowering (negligible difference with synthetic weights).
        ff = jax.nn.gelu(ff, approximate=True)
        ff = jnp.dot(ff, w2, preferred_element_type=jnp.float32) + b2

        x = _layernorm(h1 + ff, ln2_g, ln2_b)

    # ------------------------------ pooling ---------------------------------
    if pooling == "mean":
        pooled = []
        for b in range(B):
            mrow = jnp.where(col < len_ref[b], 1.0, 0.0).astype(jnp.float32)  # (1, S)
            hb = x[b * S:(b + 1) * S, :]                                      # (S, H)
            summed = jnp.dot(mrow, hb, preferred_element_type=jnp.float32)    # (1, H)
            denom = jnp.maximum(len_ref[b].astype(jnp.float32), 1e-9)         # clamp(min=1e-9)
            pooled.append(summed / denom)
        out = jnp.concatenate(pooled, axis=0)                                 # (B, H)
    elif pooling == "cls":
        out = jnp.concatenate([x[b * S:b * S + 1, :] for b in range(B)], axis=0)
    else:
        raise ValueError("Invalid pooling method")

    out_ref[...] = out.astype(out_ref.dtype)


def make_fused_call(pooling):
    kernel = functools.partial(fused_forward_kernel, pooling=pooling)
    vmem = pltpu.MemorySpace.VMEM
    smem = pltpu.MemorySpace.SMEM
    return pl.pallas_call(
        kernel,
        out_shape=jax.ShapeDtypeStruct((B, H), jnp.float32),
        in_specs=[
            pl.BlockSpec(memory_space=smem),   # lengths (B,)
            pl.BlockSpec(memory_space=vmem),   # embeddings (B*S, H)
            pl.BlockSpec(memory_space=vmem),   # emb LN (2, H)
            pl.BlockSpec(memory_space=vmem),   # Wqkv (L, H, 3H)
            pl.BlockSpec(memory_space=vmem),   # Wo   (L, H, H)
            pl.BlockSpec(memory_space=vmem),   # W1   (L, H, FFN)
            pl.BlockSpec(memory_space=vmem),   # W2   (L, FFN, H)
            pl.BlockSpec(memory_space=vmem),   # packed bias / LN slab (L, 8, 3H)
        ],
        out_specs=pl.BlockSpec(memory_space=vmem),
        # All weights + activations < 100 KiB total: everything stays resident in VMEM
        # for a single kernel invocation (no grid, no per-layer HBM round-trips).
    )


# ------------------------- parameter initialization --------------------------
def init_params(seed=0):
    key = jax.random.PRNGKey(seed)
    ks = iter(jax.random.split(key, 8 + LAYERS * 8))
    std = 0.02
    p = {
        "tok_emb": jax.random.normal(next(ks), (VOCAB, H), jnp.float32) * std,
        "pos_emb": jax.random.normal(next(ks), (S, H), jnp.float32) * std,
        "type_emb": jax.random.normal(next(ks), (1, H), jnp.float32) * std,
        "emb_ln_g": jnp.ones((1, H), jnp.float32),
        "emb_ln_b": jnp.zeros((1, H), jnp.float32),
        "layers": [],
    }
    for _ in range(LAYERS):
        layer = {
            "wq": jax.random.normal(next(ks), (H, H), jnp.float32) * std,
            "bq": jnp.zeros((1, H), jnp.float32),
            "wk": jax.random.normal(next(ks), (H, H), jnp.float32) * std,
            "bk": jnp.zeros((1, H), jnp.float32),
            "wv": jax.random.normal(next(ks), (H, H), jnp.float32) * std,
            "bv": jnp.zeros((1, H), jnp.float32),
            "wo": jax.random.normal(next(ks), (H, H), jnp.float32) * std,
            "bo": jnp.zeros((1, H), jnp.float32),
            "ln1_g": jnp.ones((1, H), jnp.float32),
            "ln1_b": jnp.zeros((1, H), jnp.float32),
            "w1": jax.random.normal(next(ks), (H, FFN), jnp.float32) * std,
            "b1": jnp.zeros((1, FFN), jnp.float32),
            "w2": jax.random.normal(next(ks), (FFN, H), jnp.float32) * std,
            "b2": jnp.zeros((1, H), jnp.float32),
            "ln2_g": jnp.ones((1, H), jnp.float32),
            "ln2_b": jnp.zeros((1, H), jnp.float32),
        }
        p["layers"].append(layer)
    return p


def pack_params(p):
    """Pack per-layer weights into a few stacked operands for the fused kernel."""
    layers = p["layers"]
    wqkv = jnp.stack([jnp.concatenate([L["wq"], L["wk"], L["wv"]], axis=1)
                      for L in layers])                                   # (L, H, 3H)
    wo = jnp.stack([L["wo"] for L in layers])                             # (L, H, H)
    w1 = jnp.stack([L["w1"] for L in layers])                             # (L, H, FFN)
    w2 = jnp.stack([L["w2"] for L in layers])                             # (L, FFN, H)

    def vec_slab(L):
        rows = jnp.zeros((8, H3), jnp.float32)
        rows = rows.at[0, :].set(
            jnp.concatenate([L["bq"], L["bk"], L["bv"]], axis=1)[0])      # bqkv (3H)
        rows = rows.at[1, :H].set(L["bo"][0])
        rows = rows.at[2, :H].set(L["ln1_g"][0])
        rows = rows.at[3, :H].set(L["ln1_b"][0])
        rows = rows.at[4, :FFN].set(L["b1"][0])
        rows = rows.at[5, :H].set(L["b2"][0])
        rows = rows.at[6, :H].set(L["ln2_g"][0])
        rows = rows.at[7, :H].set(L["ln2_b"][0])
        return rows

    vecs = jnp.stack([vec_slab(L) for L in layers])                       # (L, 8, 3H)
    embln = jnp.concatenate([p["emb_ln_g"], p["emb_ln_b"]], axis=0)       # (2, H)
    return {
        "tok_emb": p["tok_emb"], "pos_emb": p["pos_emb"], "type_emb": p["type_emb"],
        "embln": embln, "wqkv": wqkv, "wo": wo, "w1": w1, "w2": w2, "vecs": vecs,
    }


# ------------------------------ forward pass ---------------------------------
def sentence_transformer_forward(packed, input_ids, attention_mask, pooling="mean"):
    """input_ids: (B, S) int32; attention_mask: (B, S) float32 (1=token, 0=pad)."""
    if pooling not in ("mean", "cls"):
        raise ValueError("Invalid pooling method")
    # Embedding gather + position/type add stay in XLA (gather has no rectangular tile).
    emb = (jnp.take(packed["tok_emb"], input_ids, axis=0)
           + packed["pos_emb"][None, :, :]
           + packed["type_emb"][None, :, :])                              # (B, S, H)
    emb2d = emb.reshape(B * S, H).astype(jnp.float32)
    # Tokenizer padding is a contiguous prefix of ones, so per-sentence lengths
    # fully describe the mask; they ride in SMEM instead of DMAing float masks.
    lengths = jnp.sum(attention_mask, axis=-1).astype(jnp.int32)          # (B,)
    return make_fused_call(pooling)(
        lengths, emb2d, packed["embln"],
        packed["wqkv"], packed["wo"], packed["w1"], packed["w2"], packed["vecs"])


# ----------------------------------- main ------------------------------------
if __name__ == "__main__":
    params = init_params(seed=0)
    packed = pack_params(params)

    key = jax.random.PRNGKey(0)
    input_ids = jax.random.randint(key, (B, S), 0, VOCAB, dtype=jnp.int32)
    # Sentence lengths [8, 5] -> padded attention mask, like tokenizer(padding=True).
    lengths = jnp.array([S, 5], dtype=jnp.int32)
    attention_mask = (jnp.arange(S)[None, :] < lengths[:, None]).astype(jnp.float32)

    fwd = jax.jit(functools.partial(sentence_transformer_forward, pooling="mean"))
    emb = fwd(packed, input_ids, attention_mask)
    emb = jax.block_until_ready(emb)

    assert emb.shape == (B, H)
    assert bool(jnp.all(jnp.isfinite(emb)))
    print("KERNEL_OK")
</pallas_src>

<mosaic_0001>
module attributes {stable_mosaic.version = 11 : i64} {
  func.func @fused_forward_kernel(%arg0: memref<2xi32, #tpu.memory_space<smem>>, %arg1: memref<16x32xf32, #tpu.memory_space<vmem>>, %arg2: memref<2x32xf32, #tpu.memory_space<vmem>>, %arg3: memref<2x32x96xf32, #tpu.memory_space<vmem>>, %arg4: memref<2x32x32xf32, #tpu.memory_space<vmem>>, %arg5: memref<2x32x64xf32, #tpu.memory_space<vmem>>, %arg6: memref<2x64x32xf32, #tpu.memory_space<vmem>>, %arg7: memref<2x8x96xf32, #tpu.memory_space<vmem>>, %arg8: memref<2x32xf32, #tpu.memory_space<vmem>>) attributes {dimension_semantics = [], scalar_prefetch = 0 : i64, scratch_operands = 0 : i64, tpu.core_type = #tpu.core_type<tc>} {
    %c0 = arith.constant 0 : index
    %c0_0 = arith.constant 0 : index
    %0 = vector.load %arg1[%c0, %c0_0] : memref<16x32xf32, #tpu.memory_space<vmem>>, vector<16x32xf32>
    %c0_1 = arith.constant 0 : index
    %c0_2 = arith.constant 0 : index
    %1 = vector.load %arg2[%c0_1, %c0_2] : memref<2x32xf32, #tpu.memory_space<vmem>>, vector<1x32xf32>
    %c1 = arith.constant 1 : index
    %c0_3 = arith.constant 0 : index
    %2 = vector.load %arg2[%c1, %c0_3] : memref<2x32xf32, #tpu.memory_space<vmem>>, vector<1x32xf32>
    %cst = arith.constant dense<0.000000e+00> : vector<16xf32>
    %3 = vector.multi_reduction <add>, %0, %cst [1] : vector<16x32xf32> to vector<16xf32>
    %4 = vector.shape_cast %3 : vector<16xf32> to vector<16x1xf32>
    %cst_4 = arith.constant 3.200000e+01 : f32
    %5 = vector.broadcast %cst_4 : f32 to vector<16x1xf32>
    %6 = arith.divf %4, %5 : vector<16x1xf32>
    %7 = vector.broadcast %6 : vector<16x1xf32> to vector<16x32xf32>
    %8 = arith.subf %0, %7 : vector<16x32xf32>
    %9 = arith.mulf %8, %8 : vector<16x32xf32>
    %cst_5 = arith.constant dense<0.000000e+00> : vector<16xf32>
    %10 = vector.multi_reduction <add>, %9, %cst_5 [1] : vector<16x32xf32> to vector<16xf32>
    %11 = vector.shape_cast %10 : vector<16xf32> to vector<16x1xf32>
    %cst_6 = arith.constant 3.200000e+01 : f32
    %12 = vector.broadcast %cst_6 : f32 to vector<16x1xf32>
    %13 = arith.divf %11, %12 : vector<16x1xf32>
    %14 = vector.broadcast %6 : vector<16x1xf32> to vector<16x32xf32>
    %15 = arith.subf %0, %14 : vector<16x32xf32>
    %cst_7 = arith.constant 9.99999996E-13 : f32
    %16 = vector.broadcast %cst_7 : f32 to vector<16x1xf32>
    %17 = arith.addf %13, %16 : vector<16x1xf32>
    %18 = math.rsqrt %17 : vector<16x1xf32>
    %19 = vector.broadcast %18 : vector<16x1xf32> to vector<16x32xf32>
    %20 = arith.mulf %15, %19 : vector<16x32xf32>
    %21 = vector.broadcast %1 : vector<1x32xf32> to vector<16x32xf32>
    %22 = arith.mulf %20, %21 : vector<16x32xf32>
    %23 = vector.broadcast %2 : vector<1x32xf32> to vector<16x32xf32>
    %24 = arith.addf %22, %23 : vector<16x32xf32>
    %25 = tpu.iota {dimensions = array<i32: 1>} : vector<1x8xi32>
    %c0_8 = arith.constant 0 : index
    %26 = memref.load %arg0[%c0_8] : memref<2xi32, #tpu.memory_space<smem>>
    %27 = vector.broadcast %26 : i32 to vector<1x8xi32>
    %28 = arith.cmpi slt, %25, %27 : vector<1x8xi32>
    %cst_9 = arith.constant 0.000000e+00 : f32
    %cst_10 = arith.constant -1.000000e+09 : f32
    %29 = vector.broadcast %cst_9 : f32 to vector<1x8xf32>
    %30 = vector.broadcast %cst_10 : f32 to vector<1x8xf32>
    %31 = arith.select %28, %29, %30 : vector<1x8xi1>, vector<1x8xf32>
    %c1_11 = arith.constant 1 : index
    %32 = memref.load %arg0[%c1_11] : memref<2xi32, #tpu.memory_space<smem>>
    %33 = vector.broadcast %32 : i32 to vector<1x8xi32>
    %34 = arith.cmpi slt, %25, %33 : vector<1x8xi32>
    %cst_12 = arith.constant 0.000000e+00 : f32
    %cst_13 = arith.constant -1.000000e+09 : f32
    %35 = vector.broadcast %cst_12 : f32 to vector<1x8xf32>
    %36 = vector.broadcast %cst_13 : f32 to vector<1x8xf32>
    %37 = arith.select %34, %35, %36 : vector<1x8xi1>, vector<1x8xf32>
    %c0_14 = arith.constant 0 : index
    %c0_15 = arith.constant 0 : index
    %c0_16 = arith.constant 0 : index
    %38 = vector.load %arg3[%c0_14, %c0_15, %c0_16] : memref<2x32x96xf32, #tpu.memory_space<vmem>>, vector<1x32x96xf32>
    %39 = vector.shape_cast %38 : vector<1x32x96xf32> to vector<32x96xf32>
    %c0_17 = arith.constant 0 : index
    %c0_18 = arith.constant 0 : index
    %c0_19 = arith.constant 0 : index
    %40 = vector.load %arg4[%c0_17, %c0_18, %c0_19] : memref<2x32x32xf32, #tpu.memory_space<vmem>>, vector<1x32x32xf32>
    %41 = vector.shape_cast %40 : vector<1x32x32xf32> to vector<32x32xf32>
    %c0_20 = arith.constant 0 : index
    %c0_21 = arith.constant 0 : index
    %c0_22 = arith.constant 0 : index
    %42 = vector.load %arg5[%c0_20, %c0_21, %c0_22] : memref<2x32x64xf32, #tpu.memory_space<vmem>>, vector<1x32x64xf32>
    %43 = vector.shape_cast %42 : vector<1x32x64xf32> to vector<32x64xf32>
    %c0_23 = arith.constant 0 : index
    %c0_24 = arith.constant 0 : index
    %c0_25 = arith.constant 0 : index
    %44 = vector.load %arg6[%c0_23, %c0_24, %c0_25] : memref<2x64x32xf32, #tpu.memory_space<vmem>>, vector<1x64x32xf32>
    %45 = vector.shape_cast %44 : vector<1x64x32xf32> to vector<64x32xf32>
    %c0_26 = arith.constant 0 : index
    %c0_27 = arith.constant 0 : index
    %c0_28 = arith.constant 0 : index
    %46 = vector.load %arg7[%c0_26, %c0_27, %c0_28] : memref<2x8x96xf32, #tpu.memory_space<vmem>>, vector<1x8x96xf32>
    %47 = vector.shape_cast %46 : vector<1x8x96xf32> to vector<8x96xf32>
    %48 = vector.extract_strided_slice %47 {offsets = [0, 0], sizes = [1, 96], strides = [1, 1]} : vector<8x96xf32> to vector<1x96xf32>
    %49 = vector.extract_strided_slice %47 {offsets = [1, 0], sizes = [1, 32], strides = [1, 1]} : vector<8x96xf32> to vector<1x32xf32>
    %50 = vector.extract_strided_slice %47 {offsets = [2, 0], sizes = [1, 32], strides = [1, 1]} : vector<8x96xf32> to vector<1x32xf32>
    %51 = vector.extract_strided_slice %47 {offsets = [3, 0], sizes = [1, 32], strides = [1, 1]} : vector<8x96xf32> to vector<1x32xf32>
    %52 = vector.extract_strided_slice %47 {offsets = [4, 0], sizes = [1, 64], strides = [1, 1]} : vector<8x96xf32> to vector<1x64xf32>
    %53 = vector.extract_strided_slice %47 {offsets = [5, 0], sizes = [1, 32], strides = [1, 1]} : vector<8x96xf32> to vector<1x32xf32>
    %54 = vector.extract_strided_slice %47 {offsets = [6, 0], sizes = [1, 32], strides = [1, 1]} : vector<8x96xf32> to vector<1x32xf32>
    %55 = vector.extract_strided_slice %47 {offsets = [7, 0], sizes = [1, 32], strides = [1, 1]} : vector<8x96xf32> to vector<1x32xf32>
    %cst_29 = arith.constant dense<0.000000e+00> : vector<16x96xf32>
    %56 = tpu.matmul %24, %39, %cst_29 {dimension_numbers = #tpu.dot_dimension_numbers<[1], [0], [0], [1], [0, 0, 1, 1], [], []>} : vector<16x32xf32>, vector<32x96xf32>, vector<16x96xf32> -> vector<16x96xf32>
    %57 = vector.broadcast %48 : vector<1x96xf32> to vector<16x96xf32>
    %58 = arith.addf %56, %57 : vector<16x96xf32>
    %cst_30 = arith.constant 0.000000e+00 : f32
    %59 = vector.broadcast %cst_30 : f32 to vector<8x32xf32>
    %60 = vector.extract_strided_slice %58 {offsets = [0, 0], sizes = [8, 16], strides = [1, 1]} : vector<16x96xf32> to vector<8x16xf32>
    %61 = vector.extract_strided_slice %58 {offsets = [0, 32], sizes = [8, 16], strides = [1, 1]} : vector<16x96xf32> to vector<8x16xf32>
    %62 = vector.extract_strided_slice %58 {offsets = [0, 64], sizes = [8, 16], strides = [1, 1]} : vector<16x96xf32> to vector<8x16xf32>
    %cst_31 = arith.constant dense<0.000000e+00> : vector<8x8xf32>
    %63 = tpu.matmul %60, %61, %cst_31 {dimension_numbers = #tpu.dot_dimension_numbers<[1], [1], [0], [0], [0, 0, 1, 0], [], []>} : vector<8x16xf32>, vector<8x16xf32>, vector<8x8xf32> -> vector<8x8xf32>
    %cst_32 = arith.constant 2.500000e-01 : f32
    %64 = vector.broadcast %cst_32 : f32 to vector<8x8xf32>
    %65 = arith.mulf %63, %64 : vector<8x8xf32>
    %66 = vector.broadcast %31 : vector<1x8xf32> to vector<8x8xf32>
    %67 = arith.addf %65, %66 : vector<8x8xf32>
    %cst_33 = arith.constant dense<0xFF800000> : vector<8xf32>
    %68 = vector.multi_reduction <maximumf>, %67, %cst_33 [1] : vector<8x8xf32> to vector<8xf32>
    %69 = vector.shape_cast %68 : vector<8xf32> to vector<8x1xf32>
    %70 = vector.broadcast %69 : vector<8x1xf32> to vector<8x8xf32>
    %71 = arith.subf %67, %70 : vector<8x8xf32>
    %72 = math.exp %71 : vector<8x8xf32>
    %cst_34 = arith.constant dense<0.000000e+00> : vector<8xf32>
    %73 = vector.multi_reduction <add>, %72, %cst_34 [1] : vector<8x8xf32> to vector<8xf32>
    %74 = vector.shape_cast %73 : vector<8xf32> to vector<8x1xf32>
    %75 = tpu.reciprocal %74 {approx = true} : vector<8x1xf32> -> vector<8x1xf32>
    %76 = vector.broadcast %75 : vector<8x1xf32> to vector<8x8xf32>
    %77 = arith.mulf %72, %76 : vector<8x8xf32>
    %cst_35 = arith.constant dense<0.000000e+00> : vector<8x16xf32>
    %78 = tpu.matmul %77, %62, %cst_35 {dimension_numbers = #tpu.dot_dimension_numbers<[1], [0], [0], [1], [0, 0, 1, 1], [], []>} : vector<8x8xf32>, vector<8x16xf32>, vector<8x16xf32> -> vector<8x16xf32>
    %79 = vector.extract_strided_slice %41 {offsets = [0, 0], sizes = [16, 32], strides = [1, 1]} : vector<32x32xf32> to vector<16x32xf32>
    %cst_36 = arith.constant dense<0.000000e+00> : vector<8x32xf32>
    %80 = tpu.matmul %78, %79, %cst_36 {dimension_numbers = #tpu.dot_dimension_numbers<[1], [0], [0], [1], [0, 0, 1, 1], [], []>} : vector<8x16xf32>, vector<16x32xf32>, vector<8x32xf32> -> vector<8x32xf32>
    %81 = arith.addf %59, %80 : vector<8x32xf32>
    %82 = vector.extract_strided_slice %58 {offsets = [0, 16], sizes = [8, 16], strides = [1, 1]} : vector<16x96xf32> to vector<8x16xf32>
    %83 = vector.extract_strided_slice %58 {offsets = [0, 48], sizes = [8, 16], strides = [1, 1]} : vector<16x96xf32> to vector<8x16xf32>
    %84 = vector.extract_strided_slice %58 {offsets = [0, 80], sizes = [8, 16], strides = [1, 1]} : vector<16x96xf32> to vector<8x16xf32>
    %cst_37 = arith.constant dense<0.000000e+00> : vector<8x8xf32>
    %85 = tpu.matmul %82, %83, %cst_37 {dimension_numbers = #tpu.dot_dimension_numbers<[1], [1], [0], [0], [0, 0, 1, 0], [], []>} : vector<8x16xf32>, vector<8x16xf32>, vector<8x8xf32> -> vector<8x8xf32>
    %cst_38 = arith.constant 2.500000e-01 : f32
    %86 = vector.broadcast %cst_38 : f32 to vector<8x8xf32>
    %87 = arith.mulf %85, %86 : vector<8x8xf32>
    %88 = vector.broadcast %31 : vector<1x8xf32> to vector<8x8xf32>
    %89 = arith.addf %87, %88 : vector<8x8xf32>
    %cst_39 = arith.constant dense<0xFF800000> : vector<8xf32>
    %90 = vector.multi_reduction <maximumf>, %89, %cst_39 [1] : vector<8x8xf32> to vector<8xf32>
    %91 = vector.shape_cast %90 : vector<8xf32> to vector<8x1xf32>
    %92 = vector.broadcast %91 : vector<8x1xf32> to vector<8x8xf32>
    %93 = arith.subf %89, %92 : vector<8x8xf32>
    %94 = math.exp %93 : vector<8x8xf32>
    %cst_40 = arith.constant dense<0.000000e+00> : vector<8xf32>
    %95 = vector.multi_reduction <add>, %94, %cst_40 [1] : vector<8x8xf32> to vector<8xf32>
    %96 = vector.shape_cast %95 : vector<8xf32> to vector<8x1xf32>
    %97 = tpu.reciprocal %96 {approx = true} : vector<8x1xf32> -> vector<8x1xf32>
    %98 = vector.broadcast %97 : vector<8x1xf32> to vector<8x8xf32>
    %99 = arith.mulf %94, %98 : vector<8x8xf32>
    %cst_41 = arith.constant dense<0.000000e+00> : vector<8x16xf32>
    %100 = tpu.matmul %99, %84, %cst_41 {dimension_numbers = #tpu.dot_dimension_numbers<[1], [0], [0], [1], [0, 0, 1, 1], [], []>} : vector<8x8xf32>, vector<8x16xf32>, vector<8x16xf32> -> vector<8x16xf32>
    %101 = vector.extract_strided_slice %41 {offsets = [16, 0], sizes = [16, 32], strides = [1, 1]} : vector<32x32xf32> to vector<16x32xf32>
    %cst_42 = arith.constant dense<0.000000e+00> : vector<8x32xf32>
    %102 = tpu.matmul %100, %101, %cst_42 {dimension_numbers = #tpu.dot_dimension_numbers<[1], [0], [0], [1], [0, 0, 1, 1], [], []>} : vector<8x16xf32>, vector<16x32xf32>, vector<8x32xf32> -> vector<8x32xf32>
    %103 = arith.addf %81, %102 : vector<8x32xf32>
    %cst_43 = arith.constant 0.000000e+00 : f32
    %104 = vector.broadcast %cst_43 : f32 to vector<8x32xf32>
    %105 = vector.extract_strided_slice %58 {offsets = [8, 0], sizes = [8, 16], strides = [1, 1]} : vector<16x96xf32> to vector<8x16xf32>
    %106 = vector.extract_strided_slice %58 {offsets = [8, 32], sizes = [8, 16], strides = [1, 1]} : vector<16x96xf32> to vector<8x16xf32>
    %107 = vector.extract_strided_slice %58 {offsets = [8, 64], sizes = [8, 16], strides = [1, 1]} : vector<16x96xf32> to vector<8x16xf32>
    %cst_44 = arith.constant dense<0.000000e+00> : vector<8x8xf32>
    %108 = tpu.matmul %105, %106, %cst_44 {dimension_numbers = #tpu.dot_dimension_numbers<[1], [1], [0], [0], [0, 0, 1, 0], [], []>} : vector<8x16xf32>, vector<8x16xf32>, vector<8x8xf32> -> vector<8x8xf32>
    %cst_45 = arith.constant 2.500000e-01 : f32
    %109 = vector.broadcast %cst_45 : f32 to vector<8x8xf32>
    %110 = arith.mulf %108, %109 : vector<8x8xf32>
    %111 = vector.broadcast %37 : vector<1x8xf32> to vector<8x8xf32>
    %112 = arith.addf %110, %111 : vector<8x8xf32>
    %cst_46 = arith.constant dense<0xFF800000> : vector<8xf32>
    %113 = vector.multi_reduction <maximumf>, %112, %cst_46 [1] : vector<8x8xf32> to vector<8xf32>
    %114 = vector.shape_cast %113 : vector<8xf32> to vector<8x1xf32>
    %115 = vector.broadcast %114 : vector<8x1xf32> to vector<8x8xf32>
    %116 = arith.subf %112, %115 : vector<8x8xf32>
    %117 = math.exp %116 : vector<8x8xf32>
    %cst_47 = arith.constant dense<0.000000e+00> : vector<8xf32>
    %118 = vector.multi_reduction <add>, %117, %cst_47 [1] : vector<8x8xf32> to vector<8xf32>
    %119 = vector.shape_cast %118 : vector<8xf32> to vector<8x1xf32>
    %120 = tpu.reciprocal %119 {approx = true} : vector<8x1xf32> -> vector<8x1xf32>
    %121 = vector.broadcast %120 : vector<8x1xf32> to vector<8x8xf32>
    %122 = arith.mulf %117, %121 : vector<8x8xf32>
    %cst_48 = arith.constant dense<0.000000e+00> : vector<8x16xf32>
    %123 = tpu.matmul %122, %107, %cst_48 {dimension_numbers = #tpu.dot_dimension_numbers<[1], [0], [0], [1], [0, 0, 1, 1], [], []>} : vector<8x8xf32>, vector<8x16xf32>, vector<8x16xf32> -> vector<8x16xf32>
    %124 = vector.extract_strided_slice %41 {offsets = [0, 0], sizes = [16, 32], strides = [1, 1]} : vector<32x32xf32> to vector<16x32xf32>
    %cst_49 = arith.constant dense<0.000000e+00> : vector<8x32xf32>
    %125 = tpu.matmul %123, %124, %cst_49 {dimension_numbers = #tpu.dot_dimension_numbers<[1], [0], [0], [1], [0, 0, 1, 1], [], []>} : vector<8x16xf32>, vector<16x32xf32>, vector<8x32xf32> -> vector<8x32xf32>
    %126 = arith.addf %104, %125 : vector<8x32xf32>
    %127 = vector.extract_strided_slice %58 {offsets = [8, 16], sizes = [8, 16], strides = [1, 1]} : vector<16x96xf32> to vector<8x16xf32>
    %128 = vector.extract_strided_slice %58 {offsets = [8, 48], sizes = [8, 16], strides = [1, 1]} : vector<16x96xf32> to vector<8x16xf32>
    %129 = vector.extract_strided_slice %58 {offsets = [8, 80], sizes = [8, 16], strides = [1, 1]} : vector<16x96xf32> to vector<8x16xf32>
    %cst_50 = arith.constant dense<0.000000e+00> : vector<8x8xf32>
    %130 = tpu.matmul %127, %128, %cst_50 {dimension_numbers = #tpu.dot_dimension_numbers<[1], [1], [0], [0], [0, 0, 1, 0], [], []>} : vector<8x16xf32>, vector<8x16xf32>, vector<8x8xf32> -> vector<8x8xf32>
    %cst_51 = arith.constant 2.500000e-01 : f32
    %131 = vector.broadcast %cst_51 : f32 to vector<8x8xf32>
    %132 = arith.mulf %130, %131 : vector<8x8xf32>
    %133 = vector.broadcast %37 : vector<1x8xf32> to vector<8x8xf32>
    %134 = arith.addf %132, %133 : vector<8x8xf32>
    %cst_52 = arith.constant dense<0xFF800000> : vector<8xf32>
    %135 = vector.multi_reduction <maximumf>, %134, %cst_52 [1] : vector<8x8xf32> to vector<8xf32>
    %136 = vector.shape_cast %135 : vector<8xf32> to vector<8x1xf32>
    %137 = vector.broadcast %136 : vector<8x1xf32> to vector<8x8xf32>
    %138 = arith.subf %134, %137 : vector<8x8xf32>
    %139 = math.exp %138 : vector<8x8xf32>
    %cst_53 = arith.constant dense<0.000000e+00> : vector<8xf32>
    %140 = vector.multi_reduction <add>, %139, %cst_53 [1] : vector<8x8xf32> to vector<8xf32>
    %141 = vector.shape_cast %140 : vector<8xf32> to vector<8x1xf32>
    %142 = tpu.reciprocal %141 {approx = true} : vector<8x1xf32> -> vector<8x1xf32>
    %143 = vector.broadcast %142 : vector<8x1xf32> to vector<8x8xf32>
    %144 = arith.mulf %139, %143 : vector<8x8xf32>
    %cst_54 = arith.constant dense<0.000000e+00> : vector<8x16xf32>
    %145 = tpu.matmul %144, %129, %cst_54 {dimension_numbers = #tpu.dot_dimension_numbers<[1], [0], [0], [1], [0, 0, 1, 1], [], []>} : vector<8x8xf32>, vector<8x16xf32>, vector<8x16xf32> -> vector<8x16xf32>
    %146 = vector.extract_strided_slice %41 {offsets = [16, 0], sizes = [16, 32], strides = [1, 1]} : vector<32x32xf32> to vector<16x32xf32>
    %cst_55 = arith.constant dense<0.000000e+00> : vector<8x32xf32>
    %147 = tpu.matmul %145, %146, %cst_55 {dimension_numbers = #tpu.dot_dimension_numbers<[1], [0], [0], [1], [0, 0, 1, 1], [], []>} : vector<8x16xf32>, vector<16x32xf32>, vector<8x32xf32> -> vector<8x32xf32>
    %148 = arith.addf %126, %147 : vector<8x32xf32>
    %149 = tpu.concatenate %103, %148 in 0 : vector<8x32xf32>, vector<8x32xf32> -> vector<16x32xf32>
    %150 = vector.broadcast %49 : vector<1x32xf32> to vector<16x32xf32>
    %151 = arith.addf %149, %150 : vector<16x32xf32>
    %152 = arith.addf %24, %151 : vector<16x32xf32>
    %cst_56 = arith.constant dense<0.000000e+00> : vector<16xf32>
    %153 = vector.multi_reduction <add>, %152, %cst_56 [1] : vector<16x32xf32> to vector<16xf32>
    %154 = vector.shape_cast %153 : vector<16xf32> to vector<16x1xf32>
    %cst_57 = arith.constant 3.200000e+01 : f32
    %155 = vector.broadcast %cst_57 : f32 to vector<16x1xf32>
    %156 = arith.divf %154, %155 : vector<16x1xf32>
    %157 = vector.broadcast %156 : vector<16x1xf32> to vector<16x32xf32>
    %158 = arith.subf %152, %157 : vector<16x32xf32>
    %159 = arith.mulf %158, %158 : vector<16x32xf32>
    %cst_58 = arith.constant dense<0.000000e+00> : vector<16xf32>
    %160 = vector.multi_reduction <add>, %159, %cst_58 [1] : vector<16x32xf32> to vector<16xf32>
    %161 = vector.shape_cast %160 : vector<16xf32> to vector<16x1xf32>
    %cst_59 = arith.constant 3.200000e+01 : f32
    %162 = vector.broadcast %cst_59 : f32 to vector<16x1xf32>
    %163 = arith.divf %161, %162 : vector<16x1xf32>
    %164 = vector.broadcast %156 : vector<16x1xf32> to vector<16x32xf32>
    %165 = arith.subf %152, %164 : vector<16x32xf32>
    %cst_60 = arith.constant 9.99999996E-13 : f32
    %166 = vector.broadcast %cst_60 : f32 to vector<16x1xf32>
    %167 = arith.addf %163, %166 : vector<16x1xf32>
    %168 = math.rsqrt %167 : vector<16x1xf32>
    %169 = vector.broadcast %168 : vector<16x1xf32> to vector<16x32xf32>
    %170 = arith.mulf %165, %169 : vector<16x32xf32>
    %171 = vector.broadcast %50 : vector<1x32xf32> to vector<16x32xf32>
    %172 = arith.mulf %170, %171 : vector<16x32xf32>
    %173 = vector.broadcast %51 : vector<1x32xf32> to vector<16x32xf32>
    %174 = arith.addf %172, %173 : vector<16x32xf32>
    %cst_61 = arith.constant dense<0.000000e+00> : vector<16x64xf32>
    %175 = tpu.matmul %174, %43, %cst_61 {dimension_numbers = #tpu.dot_dimension_numbers<[1], [0], [0], [1], [0, 0, 1, 1], [], []>} : vector<16x32xf32>, vector<32x64xf32>, vector<16x64xf32> -> vector<16x64xf32>
    %176 = vector.broadcast %52 : vector<1x64xf32> to vector<16x64xf32>
    %177 = arith.addf %175, %176 : vector<16x64xf32>
    %178 = arith.mulf %177, %177 : vector<16x64xf32>
    %179 = arith.mulf %177, %178 : vector<16x64xf32>
    %cst_62 = arith.constant 4.471500e-02 : f32
    %180 = vector.broadcast %cst_62 : f32 to vector<16x64xf32>
    %181 = arith.mulf %180, %179 : vector<16x64xf32>
    %182 = arith.addf %177, %181 : vector<16x64xf32>
    %cst_63 = arith.constant 0.797884583 : f32
    %183 = vector.broadcast %cst_63 : f32 to vector<16x64xf32>
    %184 = arith.mulf %183, %182 : vector<16x64xf32>
    %185 = math.tanh %184 : vector<16x64xf32>
    %cst_64 = arith.constant 1.000000e+00 : f32
    %186 = vector.broadcast %cst_64 : f32 to vector<16x64xf32>
    %187 = arith.addf %186, %185 : vector<16x64xf32>
    %cst_65 = arith.constant 5.000000e-01 : f32
    %188 = vector.broadcast %cst_65 : f32 to vector<16x64xf32>
    %189 = arith.mulf %188, %187 : vector<16x64xf32>
    %190 = arith.mulf %177, %189 : vector<16x64xf32>
    %cst_66 = arith.constant dense<0.000000e+00> : vector<16x32xf32>
    %191 = tpu.matmul %190, %45, %cst_66 {dimension_numbers = #tpu.dot_dimension_numbers<[1], [0], [0], [1], [0, 0, 1, 1], [], []>} : vector<16x64xf32>, vector<64x32xf32>, vector<16x32xf32> -> vector<16x32xf32>
    %192 = vector.broadcast %53 : vector<1x32xf32> to vector<16x32xf32>
    %193 = arith.addf %191, %192 : vector<16x32xf32>
    %194 = arith.addf %174, %193 : vector<16x32xf32>
    %cst_67 = arith.constant dense<0.000000e+00> : vector<16xf32>
    %195 = vector.multi_reduction <add>, %194, %cst_67 [1] : vector<16x32xf32> to vector<16xf32>
    %196 = vector.shape_cast %195 : vector<16xf32> to vector<16x1xf32>
    %cst_68 = arith.constant 3.200000e+01 : f32
    %197 = vector.broadcast %cst_68 : f32 to vector<16x1xf32>
    %198 = arith.divf %196, %197 : vector<16x1xf32>
    %199 = vector.broadcast %198 : vector<16x1xf32> to vector<16x32xf32>
    %200 = arith.subf %194, %199 : vector<16x32xf32>
    %201 = arith.mulf %200, %200 : vector<16x32xf32>
    %cst_69 = arith.constant dense<0.000000e+00> : vector<16xf32>
    %202 = vector.multi_reduction <add>, %201, %cst_69 [1] : vector<16x32xf32> to vector<16xf32>
    %203 = vector.shape_cast %202 : vector<16xf32> to vector<16x1xf32>
    %cst_70 = arith.constant 3.200000e+01 : f32
    %204 = vector.broadcast %cst_70 : f32 to vector<16x1xf32>
    %205 = arith.divf %203, %204 : vector<16x1xf32>
    %206 = vector.broadcast %198 : vector<16x1xf32> to vector<16x32xf32>
    %207 = arith.subf %194, %206 : vector<16x32xf32>
    %cst_71 = arith.constant 9.99999996E-13 : f32
    %208 = vector.broadcast %cst_71 : f32 to vector<16x1xf32>
    %209 = arith.addf %205, %208 : vector<16x1xf32>
    %210 = math.rsqrt %209 : vector<16x1xf32>
    %211 = vector.broadcast %210 : vector<16x1xf32> to vector<16x32xf32>
    %212 = arith.mulf %207, %211 : vector<16x32xf32>
    %213 = vector.broadcast %54 : vector<1x32xf32> to vector<16x32xf32>
    %214 = arith.mulf %212, %213 : vector<16x32xf32>
    %215 = vector.broadcast %55 : vector<1x32xf32> to vector<16x32xf32>
    %216 = arith.addf %214, %215 : vector<16x32xf32>
    %c1_72 = arith.constant 1 : index
    %c0_73 = arith.constant 0 : index
    %c0_74 = arith.constant 0 : index
    %217 = vector.load %arg3[%c1_72, %c0_73, %c0_74] : memref<2x32x96xf32, #tpu.memory_space<vmem>>, vector<1x32x96xf32>
    %218 = vector.shape_cast %217 : vector<1x32x96xf32> to vector<32x96xf32>
    %c1_75 = arith.constant 1 : index
    %c0_76 = arith.constant 0 : index
    %c0_77 = arith.constant 0 : index
    %219 = vector.load %arg4[%c1_75, %c0_76, %c0_77] : memref<2x32x32xf32, #tpu.memory_space<vmem>>, vector<1x32x32xf32>
    %220 = vector.shape_cast %219 : vector<1x32x32xf32> to vector<32x32xf32>
    %c1_78 = arith.constant 1 : index
    %c0_79 = arith.constant 0 : index
    %c0_80 = arith.constant 0 : index
    %221 = vector.load %arg5[%c1_78, %c0_79, %c0_80] : memref<2x32x64xf32, #tpu.memory_space<vmem>>, vector<1x32x64xf32>
    %222 = vector.shape_cast %221 : vector<1x32x64xf32> to vector<32x64xf32>
    %c1_81 = arith.constant 1 : index
    %c0_82 = arith.constant 0 : index
    %c0_83 = arith.constant 0 : index
    %223 = vector.load %arg6[%c1_81, %c0_82, %c0_83] : memref<2x64x32xf32, #tpu.memory_space<vmem>>, vector<1x64x32xf32>
    %224 = vector.shape_cast %223 : vector<1x64x32xf32> to vector<64x32xf32>
    %c1_84 = arith.constant 1 : index
    %c0_85 = arith.constant 0 : index
    %c0_86 = arith.constant 0 : index
    %225 = vector.load %arg7[%c1_84, %c0_85, %c0_86] : memref<2x8x96xf32, #tpu.memory_space<vmem>>, vector<1x8x96xf32>
    %226 = vector.shape_cast %225 : vector<1x8x96xf32> to vector<8x96xf32>
    %227 = vector.extract_strided_slice %226 {offsets = [0, 0], sizes = [1, 96], strides = [1, 1]} : vector<8x96xf32> to vector<1x96xf32>
    %228 = vector.extract_strided_slice %226 {offsets = [1, 0], sizes = [1, 32], strides = [1, 1]} : vector<8x96xf32> to vector<1x32xf32>
    %229 = vector.extract_strided_slice %226 {offsets = [2, 0], sizes = [1, 32], strides = [1, 1]} : vector<8x96xf32> to vector<1x32xf32>
    %230 = vector.extract_strided_slice %226 {offsets = [3, 0], sizes = [1, 32], strides = [1, 1]} : vector<8x96xf32> to vector<1x32xf32>
    %231 = vector.extract_strided_slice %226 {offsets = [4, 0], sizes = [1, 64], strides = [1, 1]} : vector<8x96xf32> to vector<1x64xf32>
    %232 = vector.extract_strided_slice %226 {offsets = [5, 0], sizes = [1, 32], strides = [1, 1]} : vector<8x96xf32> to vector<1x32xf32>
    %233 = vector.extract_strided_slice %226 {offsets = [6, 0], sizes = [1, 32], strides = [1, 1]} : vector<8x96xf32> to vector<1x32xf32>
    %234 = vector.extract_strided_slice %226 {offsets = [7, 0], sizes = [1, 32], strides = [1, 1]} : vector<8x96xf32> to vector<1x32xf32>
    %cst_87 = arith.constant dense<0.000000e+00> : vector<16x96xf32>
    %235 = tpu.matmul %216, %218, %cst_87 {dimension_numbers = #tpu.dot_dimension_numbers<[1], [0], [0], [1], [0, 0, 1, 1], [], []>} : vector<16x32xf32>, vector<32x96xf32>, vector<16x96xf32> -> vector<16x96xf32>
    %236 = vector.broadcast %227 : vector<1x96xf32> to vector<16x96xf32>
    %237 = arith.addf %235, %236 : vector<16x96xf32>
    %cst_88 = arith.constant 0.000000e+00 : f32
    %238 = vector.broadcast %cst_88 : f32 to vector<8x32xf32>
    %239 = vector.extract_strided_slice %237 {offsets = [0, 0], sizes = [8, 16], strides = [1, 1]} : vector<16x96xf32> to vector<8x16xf32>
    %240 = vector.extract_strided_slice %237 {offsets = [0, 32], sizes = [8, 16], strides = [1, 1]} : vector<16x96xf32> to vector<8x16xf32>
    %241 = vector.extract_strided_slice %237 {offsets = [0, 64], sizes = [8, 16], strides = [1, 1]} : vector<16x96xf32> to vector<8x16xf32>
    %cst_89 = arith.constant dense<0.000000e+00> : vector<8x8xf32>
    %242 = tpu.matmul %239, %240, %cst_89 {dimension_numbers = #tpu.dot_dimension_numbers<[1], [1], [0], [0], [0, 0, 1, 0], [], []>} : vector<8x16xf32>, vector<8x16xf32>, vector<8x8xf32> -> vector<8x8xf32>
    %cst_90 = arith.constant 2.500000e-01 : f32
    %243 = vector.broadcast %cst_90 : f32 to vector<8x8xf32>
    %244 = arith.mulf %242, %243 : vector<8x8xf32>
    %245 = vector.broadcast %31 : vector<1x8xf32> to vector<8x8xf32>
    %246 = arith.addf %244, %245 : vector<8x8xf32>
    %cst_91 = arith.constant dense<0xFF800000> : vector<8xf32>
    %247 = vector.multi_reduction <maximumf>, %246, %cst_91 [1] : vector<8x8xf32> to vector<8xf32>
    %248 = vector.shape_cast %247 : vector<8xf32> to vector<8x1xf32>
    %249 = vector.broadcast %248 : vector<8x1xf32> to vector<8x8xf32>
    %250 = arith.subf %246, %249 : vector<8x8xf32>
    %251 = math.exp %250 : vector<8x8xf32>
    %cst_92 = arith.constant dense<0.000000e+00> : vector<8xf32>
    %252 = vector.multi_reduction <add>, %251, %cst_92 [1] : vector<8x8xf32> to vector<8xf32>
    %253 = vector.shape_cast %252 : vector<8xf32> to vector<8x1xf32>
    %254 = tpu.reciprocal %253 {approx = true} : vector<8x1xf32> -> vector<8x1xf32>
    %255 = vector.broadcast %254 : vector<8x1xf32> to vector<8x8xf32>
    %256 = arith.mulf %251, %255 : vector<8x8xf32>
    %cst_93 = arith.constant dense<0.000000e+00> : vector<8x16xf32>
    %257 = tpu.matmul %256, %241, %cst_93 {dimension_numbers = #tpu.dot_dimension_numbers<[1], [0], [0], [1], [0, 0, 1, 1], [], []>} : vector<8x8xf32>, vector<8x16xf32>, vector<8x16xf32> -> vector<8x16xf32>
    %258 = vector.extract_strided_slice %220 {offsets = [0, 0], sizes = [16, 32], strides = [1, 1]} : vector<32x32xf32> to vector<16x32xf32>
    %cst_94 = arith.constant dense<0.000000e+00> : vector<8x32xf32>
    %259 = tpu.matmul %257, %258, %cst_94 {dimension_numbers = #tpu.dot_dimension_numbers<[1], [0], [0], [1], [0, 0, 1, 1], [], []>} : vector<8x16xf32>, vector<16x32xf32>, vector<8x32xf32> -> vector<8x32xf32>
    %260 = arith.addf %238, %259 : vector<8x32xf32>
    %261 = vector.extract_strided_slice %237 {offsets = [0, 16], sizes = [8, 16], strides = [1, 1]} : vector<16x96xf32> to vector<8x16xf32>
    %262 = vector.extract_strided_slice %237 {offsets = [0, 48], sizes = [8, 16], strides = [1, 1]} : vector<16x96xf32> to vector<8x16xf32>
    %263 = vector.extract_strided_slice %237 {offsets = [0, 80], sizes = [8, 16], strides = [1, 1]} : vector<16x96xf32> to vector<8x16xf32>
    %cst_95 = arith.constant dense<0.000000e+00> : vector<8x8xf32>
    %264 = tpu.matmul %261, %262, %cst_95 {dimension_numbers = #tpu.dot_dimension_numbers<[1], [1], [0], [0], [0, 0, 1, 0], [], []>} : vector<8x16xf32>, vector<8x16xf32>, vector<8x8xf32> -> vector<8x8xf32>
    %cst_96 = arith.constant 2.500000e-01 : f32
    %265 = vector.broadcast %cst_96 : f32 to vector<8x8xf32>
    %266 = arith.mulf %264, %265 : vector<8x8xf32>
    %267 = vector.broadcast %31 : vector<1x8xf32> to vector<8x8xf32>
    %268 = arith.addf %266, %267 : vector<8x8xf32>
    %cst_97 = arith.constant dense<0xFF800000> : vector<8xf32>
    %269 = vector.multi_reduction <maximumf>, %268, %cst_97 [1] : vector<8x8xf32> to vector<8xf32>
    %270 = vector.shape_cast %269 : vector<8xf32> to vector<8x1xf32>
    %271 = vector.broadcast %270 : vector<8x1xf32> to vector<8x8xf32>
    %272 = arith.subf %268, %271 : vector<8x8xf32>
    %273 = math.exp %272 : vector<8x8xf32>
    %cst_98 = arith.constant dense<0.000000e+00> : vector<8xf32>
    %274 = vector.multi_reduction <add>, %273, %cst_98 [1] : vector<8x8xf32> to vector<8xf32>
    %275 = vector.shape_cast %274 : vector<8xf32> to vector<8x1xf32>
    %276 = tpu.reciprocal %275 {approx = true} : vector<8x1xf32> -> vector<8x1xf32>
    %277 = vector.broadcast %276 : vector<8x1xf32> to vector<8x8xf32>
    %278 = arith.mulf %273, %277 : vector<8x8xf32>
    %cst_99 = arith.constant dense<0.000000e+00> : vector<8x16xf32>
    %279 = tpu.matmul %278, %263, %cst_99 {dimension_numbers = #tpu.dot_dimension_numbers<[1], [0], [0], [1], [0, 0, 1, 1], [], []>} : vector<8x8xf32>, vector<8x16xf32>, vector<8x16xf32> -> vector<8x16xf32>
    %280 = vector.extract_strided_slice %220 {offsets = [16, 0], sizes = [16, 32], strides = [1, 1]} : vector<32x32xf32> to vector<16x32xf32>
    %cst_100 = arith.constant dense<0.000000e+00> : vector<8x32xf32>
    %281 = tpu.matmul %279, %280, %cst_100 {dimension_numbers = #tpu.dot_dimension_numbers<[1], [0], [0], [1], [0, 0, 1, 1], [], []>} : vector<8x16xf32>, vector<16x32xf32>, vector<8x32xf32> -> vector<8x32xf32>
    %282 = arith.addf %260, %281 : vector<8x32xf32>
    %cst_101 = arith.constant 0.000000e+00 : f32
    %283 = vector.broadcast %cst_101 : f32 to vector<8x32xf32>
    %284 = vector.extract_strided_slice %237 {offsets = [8, 0], sizes = [8, 16], strides = [1, 1]} : vector<16x96xf32> to vector<8x16xf32>
    %285 = vector.extract_strided_slice %237 {offsets = [8, 32], sizes = [8, 16], strides = [1, 1]} : vector<16x96xf32> to vector<8x16xf32>
    %286 = vector.extract_strided_slice %237 {offsets = [8, 64], sizes = [8, 16], strides = [1, 1]} : vector<16x96xf32> to vector<8x16xf32>
    %cst_102 = arith.constant dense<0.000000e+00> : vector<8x8xf32>
    %287 = tpu.matmul %284, %285, %cst_102 {dimension_numbers = #tpu.dot_dimension_numbers<[1], [1], [0], [0], [0, 0, 1, 0], [], []>} : vector<8x16xf32>, vector<8x16xf32>, vector<8x8xf32> -> vector<8x8xf32>
    %cst_103 = arith.constant 2.500000e-01 : f32
    %288 = vector.broadcast %cst_103 : f32 to vector<8x8xf32>
    %289 = arith.mulf %287, %288 : vector<8x8xf32>
    %290 = vector.broadcast %37 : vector<1x8xf32> to vector<8x8xf32>
    %291 = arith.addf %289, %290 : vector<8x8xf32>
    %cst_104 = arith.constant dense<0xFF800000> : vector<8xf32>
    %292 = vector.multi_reduction <maximumf>, %291, %cst_104 [1] : vector<8x8xf32> to vector<8xf32>
    %293 = vector.shape_cast %292 : vector<8xf32> to vector<8x1xf32>
    %294 = vector.broadcast %293 : vector<8x1xf32> to vector<8x8xf32>
    %295 = arith.subf %291, %294 : vector<8x8xf32>
    %296 = math.exp %295 : vector<8x8xf32>
    %cst_105 = arith.constant dense<0.000000e+00> : vector<8xf32>
    %297 = vector.multi_reduction <add>, %296, %cst_105 [1] : vector<8x8xf32> to vector<8xf32>
    %298 = vector.shape_cast %297 : vector<8xf32> to vector<8x1xf32>
    %299 = tpu.reciprocal %298 {approx = true} : vector<8x1xf32> -> vector<8x1xf32>
    %300 = vector.broadcast %299 : vector<8x1xf32> to vector<8x8xf32>
    %301 = arith.mulf %296, %300 : vector<8x8xf32>
    %cst_106 = arith.constant dense<0.000000e+00> : vector<8x16xf32>
    %302 = tpu.matmul %301, %286, %cst_106 {dimension_numbers = #tpu.dot_dimension_numbers<[1], [0], [0], [1], [0, 0, 1, 1], [], []>} : vector<8x8xf32>, vector<8x16xf32>, vector<8x16xf32> -> vector<8x16xf32>
    %303 = vector.extract_strided_slice %220 {offsets = [0, 0], sizes = [16, 32], strides = [1, 1]} : vector<32x32xf32> to vector<16x32xf32>
    %cst_107 = arith.constant dense<0.000000e+00> : vector<8x32xf32>
    %304 = tpu.matmul %302, %303, %cst_107 {dimension_numbers = #tpu.dot_dimension_numbers<[1], [0], [0], [1], [0, 0, 1, 1], [], []>} : vector<8x16xf32>, vector<16x32xf32>, vector<8x32xf32> -> vector<8x32xf32>
    %305 = arith.addf %283, %304 : vector<8x32xf32>
    %306 = vector.extract_strided_slice %237 {offsets = [8, 16], sizes = [8, 16], strides = [1, 1]} : vector<16x96xf32> to vector<8x16xf32>
    %307 = vector.extract_strided_slice %237 {offsets = [8, 48], sizes = [8, 16], strides = [1, 1]} : vector<16x96xf32> to vector<8x16xf32>
    %308 = vector.extract_strided_slice %237 {offsets = [8, 80], sizes = [8, 16], strides = [1, 1]} : vector<16x96xf32> to vector<8x16xf32>
    %cst_108 = arith.constant dense<0.000000e+00> : vector<8x8xf32>
    %309 = tpu.matmul %306, %307, %cst_108 {dimension_numbers = #tpu.dot_dimension_numbers<[1], [1], [0], [0], [0, 0, 1, 0], [], []>} : vector<8x16xf32>, vector<8x16xf32>, vector<8x8xf32> -> vector<8x8xf32>
    %cst_109 = arith.constant 2.500000e-01 : f32
    %310 = vector.broadcast %cst_109 : f32 to vector<8x8xf32>
    %311 = arith.mulf %309, %310 : vector<8x8xf32>
    %312 = vector.broadcast %37 : vector<1x8xf32> to vector<8x8xf32>
    %313 = arith.addf %311, %312 : vector<8x8xf32>
    %cst_110 = arith.constant dense<0xFF800000> : vector<8xf32>
    %314 = vector.multi_reduction <maximumf>, %313, %cst_110 [1] : vector<8x8xf32> to vector<8xf32>
    %315 = vector.shape_cast %314 : vector<8xf32> to vector<8x1xf32>
    %316 = vector.broadcast %315 : vector<8x1xf32> to vector<8x8xf32>
    %317 = arith.subf %313, %316 : vector<8x8xf32>
    %318 = math.exp %317 : vector<8x8xf32>
    %cst_111 = arith.constant dense<0.000000e+00> : vector<8xf32>
    %319 = vector.multi_reduction <add>, %318, %cst_111 [1] : vector<8x8xf32> to vector<8xf32>
    %320 = vector.shape_cast %319 : vector<8xf32> to vector<8x1xf32>
    %321 = tpu.reciprocal %320 {approx = true} : vector<8x1xf32> -> vector<8x1xf32>
    %322 = vector.broadcast %321 : vector<8x1xf32> to vector<8x8xf32>
    %323 = arith.mulf %318, %322 : vector<8x8xf32>
    %cst_112 = arith.constant dense<0.000000e+00> : vector<8x16xf32>
    %324 = tpu.matmul %323, %308, %cst_112 {dimension_numbers = #tpu.dot_dimension_numbers<[1], [0], [0], [1], [0, 0, 1, 1], [], []>} : vector<8x8xf32>, vector<8x16xf32>, vector<8x16xf32> -> vector<8x16xf32>
    %325 = vector.extract_strided_slice %220 {offsets = [16, 0], sizes = [16, 32], strides = [1, 1]} : vector<32x32xf32> to vector<16x32xf32>
    %cst_113 = arith.constant dense<0.000000e+00> : vector<8x32xf32>
    %326 = tpu.matmul %324, %325, %cst_113 {dimension_numbers = #tpu.dot_dimension_numbers<[1], [0], [0], [1], [0, 0, 1, 1], [], []>} : vector<8x16xf32>, vector<16x32xf32>, vector<8x32xf32> -> vector<8x32xf32>
    %327 = arith.addf %305, %326 : vector<8x32xf32>
    %328 = tpu.concatenate %282, %327 in 0 : vector<8x32xf32>, vector<8x32xf32> -> vector<16x32xf32>
    %329 = vector.broadcast %228 : vector<1x32xf32> to vector<16x32xf32>
    %330 = arith.addf %328, %329 : vector<16x32xf32>
    %331 = arith.addf %216, %330 : vector<16x32xf32>
    %cst_114 = arith.constant dense<0.000000e+00> : vector<16xf32>
    %332 = vector.multi_reduction <add>, %331, %cst_114 [1] : vector<16x32xf32> to vector<16xf32>
    %333 = vector.shape_cast %332 : vector<16xf32> to vector<16x1xf32>
    %cst_115 = arith.constant 3.200000e+01 : f32
    %334 = vector.broadcast %cst_115 : f32 to vector<16x1xf32>
    %335 = arith.divf %333, %334 : vector<16x1xf32>
    %336 = vector.broadcast %335 : vector<16x1xf32> to vector<16x32xf32>
    %337 = arith.subf %331, %336 : vector<16x32xf32>
    %338 = arith.mulf %337, %337 : vector<16x32xf32>
    %cst_116 = arith.constant dense<0.000000e+00> : vector<16xf32>
    %339 = vector.multi_reduction <add>, %338, %cst_116 [1] : vector<16x32xf32> to vector<16xf32>
    %340 = vector.shape_cast %339 : vector<16xf32> to vector<16x1xf32>
    %cst_117 = arith.constant 3.200000e+01 : f32
    %341 = vector.broadcast %cst_117 : f32 to vector<16x1xf32>
    %342 = arith.divf %340, %341 : vector<16x1xf32>
    %343 = vector.broadcast %335 : vector<16x1xf32> to vector<16x32xf32>
    %344 = arith.subf %331, %343 : vector<16x32xf32>
    %cst_118 = arith.constant 9.99999996E-13 : f32
    %345 = vector.broadcast %cst_118 : f32 to vector<16x1xf32>
    %346 = arith.addf %342, %345 : vector<16x1xf32>
    %347 = math.rsqrt %346 : vector<16x1xf32>
    %348 = vector.broadcast %347 : vector<16x1xf32> to vector<16x32xf32>
    %349 = arith.mulf %344, %348 : vector<16x32xf32>
    %350 = vector.broadcast %229 : vector<1x32xf32> to vector<16x32xf32>
    %351 = arith.mulf %349, %350 : vector<16x32xf32>
    %352 = vector.broadcast %230 : vector<1x32xf32> to vector<16x32xf32>
    %353 = arith.addf %351, %352 : vector<16x32xf32>
    %cst_119 = arith.constant dense<0.000000e+00> : vector<16x64xf32>
    %354 = tpu.matmul %353, %222, %cst_119 {dimension_numbers = #tpu.dot_dimension_numbers<[1], [0], [0], [1], [0, 0, 1, 1], [], []>} : vector<16x32xf32>, vector<32x64xf32>, vector<16x64xf32> -> vector<16x64xf32>
    %355 = vector.broadcast %231 : vector<1x64xf32> to vector<16x64xf32>
    %356 = arith.addf %354, %355 : vector<16x64xf32>
    %357 = arith.mulf %356, %356 : vector<16x64xf32>
    %358 = arith.mulf %356, %357 : vector<16x64xf32>
    %cst_120 = arith.constant 4.471500e-02 : f32
    %359 = vector.broadcast %cst_120 : f32 to vector<16x64xf32>
    %360 = arith.mulf %359, %358 : vector<16x64xf32>
    %361 = arith.addf %356, %360 : vector<16x64xf32>
    %cst_121 = arith.constant 0.797884583 : f32
    %362 = vector.broadcast %cst_121 : f32 to vector<16x64xf32>
    %363 = arith.mulf %362, %361 : vector<16x64xf32>
    %364 = math.tanh %363 : vector<16x64xf32>
    %cst_122 = arith.constant 1.000000e+00 : f32
    %365 = vector.broadcast %cst_122 : f32 to vector<16x64xf32>
    %366 = arith.addf %365, %364 : vector<16x64xf32>
    %cst_123 = arith.constant 5.000000e-01 : f32
    %367 = vector.broadcast %cst_123 : f32 to vector<16x64xf32>
    %368 = arith.mulf %367, %366 : vector<16x64xf32>
    %369 = arith.mulf %356, %368 : vector<16x64xf32>
    %cst_124 = arith.constant dense<0.000000e+00> : vector<16x32xf32>
    %370 = tpu.matmul %369, %224, %cst_124 {dimension_numbers = #tpu.dot_dimension_numbers<[1], [0], [0], [1], [0, 0, 1, 1], [], []>} : vector<16x64xf32>, vector<64x32xf32>, vector<16x32xf32> -> vector<16x32xf32>
    %371 = vector.broadcast %232 : vector<1x32xf32> to vector<16x32xf32>
    %372 = arith.addf %370, %371 : vector<16x32xf32>
    %373 = arith.addf %353, %372 : vector<16x32xf32>
    %cst_125 = arith.constant dense<0.000000e+00> : vector<16xf32>
    %374 = vector.multi_reduction <add>, %373, %cst_125 [1] : vector<16x32xf32> to vector<16xf32>
    %375 = vector.shape_cast %374 : vector<16xf32> to vector<16x1xf32>
    %cst_126 = arith.constant 3.200000e+01 : f32
    %376 = vector.broadcast %cst_126 : f32 to vector<16x1xf32>
    %377 = arith.divf %375, %376 : vector<16x1xf32>
    %378 = vector.broadcast %377 : vector<16x1xf32> to vector<16x32xf32>
    %379 = arith.subf %373, %378 : vector<16x32xf32>
    %380 = arith.mulf %379, %379 : vector<16x32xf32>
    %cst_127 = arith.constant dense<0.000000e+00> : vector<16xf32>
    %381 = vector.multi_reduction <add>, %380, %cst_127 [1] : vector<16x32xf32> to vector<16xf32>
    %382 = vector.shape_cast %381 : vector<16xf32> to vector<16x1xf32>
    %cst_128 = arith.constant 3.200000e+01 : f32
    %383 = vector.broadcast %cst_128 : f32 to vector<16x1xf32>
    %384 = arith.divf %382, %383 : vector<16x1xf32>
    %385 = vector.broadcast %377 : vector<16x1xf32> to vector<16x32xf32>
    %386 = arith.subf %373, %385 : vector<16x32xf32>
    %cst_129 = arith.constant 9.99999996E-13 : f32
    %387 = vector.broadcast %cst_129 : f32 to vector<16x1xf32>
    %388 = arith.addf %384, %387 : vector<16x1xf32>
    %389 = math.rsqrt %388 : vector<16x1xf32>
    %390 = vector.broadcast %389 : vector<16x1xf32> to vector<16x32xf32>
    %391 = arith.mulf %386, %390 : vector<16x32xf32>
    %392 = vector.broadcast %233 : vector<1x32xf32> to vector<16x32xf32>
    %393 = arith.mulf %391, %392 : vector<16x32xf32>
    %394 = vector.broadcast %234 : vector<1x32xf32> to vector<16x32xf32>
    %395 = arith.addf %393, %394 : vector<16x32xf32>
    %c0_130 = arith.constant 0 : index
    %396 = memref.load %arg0[%c0_130] : memref<2xi32, #tpu.memory_space<smem>>
    %397 = vector.broadcast %396 : i32 to vector<1x8xi32>
    %398 = arith.cmpi slt, %25, %397 : vector<1x8xi32>
    %cst_131 = arith.constant 1.000000e+00 : f32
    %cst_132 = arith.constant 0.000000e+00 : f32
    %399 = vector.broadcast %cst_131 : f32 to vector<1x8xf32>
    %400 = vector.broadcast %cst_132 : f32 to vector<1x8xf32>
    %401 = arith.select %398, %399, %400 : vector<1x8xi1>, vector<1x8xf32>
    %402 = vector.extract_strided_slice %395 {offsets = [0, 0], sizes = [8, 32], strides = [1, 1]} : vector<16x32xf32> to vector<8x32xf32>
    %cst_133 = arith.constant dense<0.000000e+00> : vector<1x32xf32>
    %403 = tpu.matmul %401, %402, %cst_133 {dimension_numbers = #tpu.dot_dimension_numbers<[1], [0], [0], [1], [0, 0, 1, 1], [], []>} : vector<1x8xf32>, vector<8x32xf32>, vector<1x32xf32> -> vector<1x32xf32>
    %c0_134 = arith.constant 0 : index
    %404 = memref.load %arg0[%c0_134] : memref<2xi32, #tpu.memory_space<smem>>
    %405 = arith.sitofp %404 : i32 to f32
    %cst_135 = arith.constant 9.99999971E-10 : f32
    %406 = arith.maximumf %405, %cst_135 : f32
    %407 = vector.broadcast %406 : f32 to vector<1x32xf32>
    %408 = arith.divf %403, %407 : vector<1x32xf32>
    %c1_136 = arith.constant 1 : index
    %409 = memref.load %arg0[%c1_136] : memref<2xi32, #tpu.memory_space<smem>>
    %410 = vector.broadcast %409 : i32 to vector<1x8xi32>
    %411 = arith.cmpi slt, %25, %410 : vector<1x8xi32>
    %cst_137 = arith.constant 1.000000e+00 : f32
    %cst_138 = arith.constant 0.000000e+00 : f32
    %412 = vector.broadcast %cst_137 : f32 to vector<1x8xf32>
    %413 = vector.broadcast %cst_138 : f32 to vector<1x8xf32>
    %414 = arith.select %411, %412, %413 : vector<1x8xi1>, vector<1x8xf32>
    %415 = vector.extract_strided_slice %395 {offsets = [8, 0], sizes = [8, 32], strides = [1, 1]} : vector<16x32xf32> to vector<8x32xf32>
    %cst_139 = arith.constant dense<0.000000e+00> : vector<1x32xf32>
    %416 = tpu.matmul %414, %415, %cst_139 {dimension_numbers = #tpu.dot_dimension_numbers<[1], [0], [0], [1], [0, 0, 1, 1], [], []>} : vector<1x8xf32>, vector<8x32xf32>, vector<1x32xf32> -> vector<1x32xf32>
    %c1_140 = arith.constant 1 : index
    %417 = memref.load %arg0[%c1_140] : memref<2xi32, #tpu.memory_space<smem>>
    %418 = arith.sitofp %417 : i32 to f32
    %cst_141 = arith.constant 9.99999971E-10 : f32
    %419 = arith.maximumf %418, %cst_141 : f32
    %420 = vector.broadcast %419 : f32 to vector<1x32xf32>
    %421 = arith.divf %416, %420 : vector<1x32xf32>
    %422 = tpu.concatenate %408, %421 in 0 : vector<1x32xf32>, vector<1x32xf32> -> vector<2x32xf32>
    %c0_142 = arith.constant 0 : index
    %c0_143 = arith.constant 0 : index
    %423 = vector.load %arg8[%c0_142, %c0_143] : memref<2x32xf32, #tpu.memory_space<vmem>>, vector<2x32xf32>
    tpu.vector_store %arg8[%c0_142, %c0_143], %422 {strides = array<i32>} : memref<2x32xf32, #tpu.memory_space<vmem>>, vector<2x32xf32>,
    return
  }
}

</mosaic_0001>

<bundles_post_ra>
// kernel: sentence_transformer_forward.1
= control target key start
LH: loop header
LB: loop body
LE: loop exit
PB: predicated region body
PF: predicated region fallthrough
CT: control target
= control target key end

     0   :  { %13 = vsyncpa [#allocation4], 0  ;;  %s4109_s0 = inlined_call_operand.vmem [shape: s32[2], index: 0, kind: input, shape index: {}]   ;;  %s4110_s1 = inlined_call_operand.vmem [shape: f32[16,32], index: 1, kind: input, shape index: {}]   ;;  %s4111_s2 = inlined_call_operand.vmem [shape: f32[2,32], index: 2, kind: input, shape index: {}]   ;;  %s4112_s3 = inlined_call_operand.vmem [shape: f32[2,32,96], index: 3, kind: input, shape index: {}]   ;;  %s4113_s4 = inlined_call_operand.vmem [shape: f32[2,32,32], index: 4, kind: input, shape index: {}]   ;;  %s4114_s5 = inlined_call_operand.vmem [shape: f32[2,32,64], index: 5, kind: input, shape index: {}]   ;;  %s4115_s6 = inlined_call_operand.vmem [shape: f32[2,64,32], index: 6, kind: input, shape index: {}]   ;;  %s4116_s7 = inlined_call_operand.vmem [shape: f32[2,8,96], index: 7, kind: input, shape index: {}]   ;;  %s4117_s8 = inlined_call_operand.hbm [shape: f32[2,32], index: 8, kind: output, shape index: {}]  }
   0x1   :  { %14 = vsyncpa [#allocation3], 0  ;;  %s21_s29 = sshll.u32 %s4109_s0, 4  ;;  %s22_s29 = int_to_ptr.vmem [resolvable:$true] %s21_s29 }
   0x2   :  { %s3527_s30 = scalar_lea.vmem %s22_s29, 16  ;;  %p3532_p1 = scmp.lt.s32.totalorder %s22_s29, %s22_s29 }
   0x3   :  { %p3528_p0 = scmp.ne.s32.totalorder %s22_s29, %s3527_s30  ;;  %p3533_p2 = scmp.lt.s32.totalorder %s3527_s30, %s3527_s30 }
   0x5   :  { %p3534_p3 = por %p3533_p2, %p3532_p1 }
   0x7   :  { %p3535_p4 = pnand %p3534_p3, %p3528_p0 }
   0x9   :  { %3538 = shalt.err (!%p3535_p4)
}
   0xa   :  { %s3565_s9 = smov [#allocation2]  }
   0xb   :  { %24 = dma.vmem_to_smem %s22_s29, 16, %s3565_s9, [#allocation4]  }
   0xc   :  { %3561 = dma.done.wait [#allocation4], 16  }
   0xd   :  { %3562 = vsyncadd [#allocation4], 4294967280 }
   0xe   :  { %42 = sfence }
   0xf   :  { %v43_v0 = vld [vmem:[%s4110_s1] sm:$0xff]  ;;  %vm47_vm0 = vcmask 261120   ;;  %v44_v1 = vld [vmem:[%s4110_s1 + $0x8] sm:$0xff]  ;;  %v99_v16 = vld [vmem:[%s4112_s3 + $0x10] sm:$0xff]  ;;  %v3566_v36 = vmov 0.0   ;;  %v87_v37 = vlaneseq  ;;  %vm3567_vm1 = vmmov 0  }
  0x10   :  { %v48_v2 = vsel %vm47_vm0, %v43_v0, 0.0  ;;  %v51_v3 = vsel %vm47_vm0, %v44_v1, 0.0  ;;  %v97_v14 = vld [vmem:[%s4112_s3] sm:$0xff]  ;;  %v98_v15 = vld [vmem:[%s4112_s3 + $0x8] sm:$0xff]  ;;  %v100_v18 = vld [vmem:[%s4112_s3 + $0x18] sm:$0xff]  ;;  %3146 = vmatprep.subr.mxu1 %v3566_v36  ;;  %3148 = vmatprep.mubr.msk.f32.mxu1 %vm3567_vm1, %v3566_v36  ;;  %s3568_s25 = smov 80  }
  0x11   :  { %49 = vadd.xlane.f32.xlu0 %v48_v2  ;;  %v3363_v17 = vpack.c.bf16 %v98_v15, %v97_v14  ;;  %v3367_v19 = vpack.c.bf16 %v100_v18, %v99_v16  ;;  %v2961_v27 = vld [vmem:[%s4111_s2] ss:$0 sm:$0xff]  ;;  %v2962_v29 = vld [vmem:[%s4111_s2 + $0x1] ss:$0 sm:$0xff]  ;;  %v3663_v38 = vshrl.u32 %v87_v37, 7  ;;  %s3569_s26 = smov 96  }
  0x12   :  { %v3673_v40 = vld [vmem:[%s4116_s7] sm:$0xff]  ;;  %s3570_s27 = smov 112   ;;  %vm206_vm2 = vcmask 130048   ;;  %s3692_s28 = sld [smem:[#allocation2]]  ;;  %v3694_v49 = vand.u32 127, %v87_v37  ;;  %vm283_vm4 = vcmask 64512  }
  0x13   :  { %3364 = vmatprep.subr.bf16.mxu0 %v3363_v17  ;;  %v120_v39 = vsub.s32 0, %v3663_v38  ;;  %v3571_v53 = vmov -1e+09   ;;  %s3572_s29 = smov 64   ;;  %s3573_s30 = smov 48   ;;  %vm1316_vm6 = vcmask 523264  }
  0x14   :  { %3366 = vmatpush3.bf16.msra.mxu0 %v3363_v17  ;;  %s3764_s15 = sld [smem:[#allocation2 + $0x1]]  ;;  %s3575_s14 = smov 1e-09   ;;  %vm2942_vm7 = vcmask 1040384   ;;  %vm2944_vm8 = vcmask 254976  }
  0x15   :  { %52 = vadd.xlane.f32.xlu0 %v51_v3  ;;  %3368 = vmatprep.subr.bf16.mxu0 %v3367_v19  ;;  %v121_v41 = vrot.slane %v3673_v40, %v120_v39 }
  0x18   :  { %3370 = vmatpush3.bf16.msra.mxu0 %v3367_v19  ;;  %v90_v50 = vstv %s3692_s28  ;;  %v101_v19 = vld [vmem:[%s4113_s4] sm:$0xff]  ;;  %s2855_s13 = scvt.s32.f32 %s3692_s28 }
  0x19   :  { %3156 = vmatprep.subr.mxu0 %v3566_v36  ;;  %vm3698_vm3 = vcmp.lt.s32.totalorder %v3694_v49, %v90_v50 }
  0x1a   :  { %v3705_v54 = vsel %vm3698_vm3, 0.0, %v3571_v53  ;;  %v94_v37 = vstv %s3764_s15 }
  0x1b   :  { %vm3768_vm5 = vcmp.lt.s32.totalorder %v3694_v49, %v94_v37 }
  0x9e   :  { %v50_v4 = vpop.xlane.xlu0 %49 }
  0x9f   :  { %v55_v5 = vmul.f32 0.03125, %v50_v4 }
  0xa1   :  { %v57_v6 = vsub.f32 %v43_v0, %v55_v5 }
  0xa2   :  { %v53_v7 = vpop.xlane.xlu0 %52 }
  0xa3   :  { %v56_v8 = vmul.f32 0.03125, %v53_v7  ;;  %v59_v9 = vmul.f32 %v57_v6, %v57_v6 }
  0xa5   :  { %v58_v10 = vsub.f32 %v44_v1, %v56_v8  ;;  %v61_v11 = vsel %vm47_vm0, %v59_v9, 0.0 }
  0xa6   :  { %62 = vadd.xlane.f32.xlu1 %v61_v11  ;;  %v103_v11 = vld [vmem:[%s4113_s4 + $0x10] sm:$0xff] }
  0xa7   :  { %v60_v12 = vmul.f32 %v58_v10, %v58_v10 }
  0xa9   :  { %v64_v13 = vsel %vm47_vm0, %v60_v12, 0.0  ;;  %v104_v12 = vld [vmem:[%s4113_s4 + $0x18] sm:$0xff] }
  0xaa   :  { %65 = vadd.xlane.f32.xlu1 %v64_v13  ;;  %v3574_v13 = vmov 0.0|0.0   ;;  %v3372_v14 = vpack.c.bf16 %v104_v12, %v103_v11 }
 0x133   :  { %v63_v20 = vpop.xlane.xlu1 %62 }
 0x134   :  { %v67_v21 = vmul.f32 0.03125, %v63_v20  ;;  %v102_v20 = vld [vmem:[%s4113_s4 + $0x8] sm:$0xff] }
 0x136   :  { %v69_v22 = vadd.f32 1e-12, %v67_v21 }
 0x137   :  { %v66_v23 = vpop.xlane.xlu1 %65 }
 0x138   :  { %3463 = vrsqrt.f32 %v69_v22  ;;  %v68_v24 = vmul.f32 0.03125, %v66_v23  ;;  %v3739_v23 = vpack.c.bf16 %v102_v20, %v101_v19 }
 0x13a   :  { %v70_v25 = vadd.f32 1e-12, %v68_v24 }
 0x13c   :  { %3465 = vrsqrt.f32 %v70_v25 }
 0x142   :  { %v3464_v26 = vpop.eup %3463 }
 0x143   :  { %v73_v28 = vmul.f32 %v3464_v26, %v57_v6 }
 0x145   :  { %v79_v30 = vmul.f32 %v2961_v27, %v73_v28 }
 0x146   :  { %v3466_v31 = vpop.eup %3465 }
 0x147   :  { %v74_v32 = vmul.f32 %v3466_v31, %v58_v10  ;;  %v3653_v33 = vadd.f32 %v2962_v29, %v79_v30 }
 0x149   :  { %v80_v34 = vmul.f32 %v2961_v27, %v74_v32  ;;  %3143 = vmatprep.mubr.msk.f32.mxu0 %vm47_vm0, %v3653_v33 }
 0x14b   :  { %v3657_v35 = vadd.f32 %v2962_v29, %v80_v34 }
 0x14d   :  { %3144 = vmatmul.mubr.msk.f32.vlgmr.msra.gmra.mrb[0].mxu0 %vm47_vm0, %v3657_v35 }
 0x14e   :  { %3158 = vmatprep.mubr.msk.f32.mxu0 %vm3567_vm1, %v3566_v36 }
 0x220   :  { %v3145_v42 = vpop.f32.mrb[0].mxu0 }
 0x221   :  { %v3678_v43 = vadd.f32 %v3145_v42, %v121_v41  ;;  %v194_v44 = vpop.f32.mrb[1].mxu0 }
 0x222   :  { %v195_v45 = vadd.f32 %v194_v44, %v121_v41 }
 0x224   :  { %373 = vrot.lane.b32.xlu1 %v195_v45, %s3568_s25  ;;  %204 = vrot.lane.b32.xlu0 %v195_v45, %s3569_s26 }
 0x228   :  { %371 = vrot.lane.b32.xlu1 %v195_v45, %s3570_s27 }
 0x296   :  { %v374_v46 = vpop.permute.xlu1 %373  ;;  %v205_v47 = vpop.permute.xlu0 %204 }
 0x297   :  { %3147 = vmatpush3.xpose.msk.msra.mxu1 %vm206_vm2, %v205_v47  ;;  %3157 = vmatpush3.xpose.msk.msra.mxu0 %vm206_vm2, %v374_v46  ;;  %v3775_v47 = vsel %vm3768_vm5, 0.0, %v3571_v53  ;;  %v1165_v53 = vsub.s32 1, %v3663_v38 }
 0x298   :  { %3151 = vmatprep.subr.mxu1 %v3566_v36  ;;  %3371 = vmatprep.subr.bf16.mxu0 %v3574_v13 }
 0x29a   :  { %v372_v48 = vpop.permute.xlu1 %371  ;;  %3149 = vmatmul.mubr.msk.f32.vlgmr.msra.gmra.mrb[0].mxu1 %vm206_vm2, %v195_v45 }
 0x29b   :  { %3159 = vmatmul.mubr.msk.f32.vlgmr.msra.gmra.mrb[2].mxu0 %vm206_vm2, %v372_v48  ;;  %3153 = vmatprep.mubr.msk.f32.mxu1 %vm3567_vm1, %v3566_v36 }
 0x29c   :  { %3170 = vmatprep.mubr.msk.f32.mxu0 %vm3567_vm1, %v3566_v36  ;;  %3373 = vmatpush3.bf16.msra.mxu0 %v3372_v14 }
 0x29d   :  { %3180 = vmatprep.subr.mxu0 %v3566_v36 }
 0x36d   :  { %v277_v52 = vpop.f32.mrb[0].mxu1 }
 0x36e   :  { %v281_v55 = vmul.f32 0.25, %v277_v52  ;;  %v3150_v56 = vpop.f32.mrb[1].mxu1  ;;  %v445_v57 = vpop.f32.mrb[2].mxu0 }
 0x36f   :  { %v449_v58 = vmul.f32 0.25, %v445_v57  ;;  %v3160_v59 = vpop.f32.mrb[3].mxu0 }
 0x370   :  { %v282_v60 = vadd.f32 %v281_v55, %v3705_v54 }
 0x371   :  { %v450_v61 = vadd.f32 %v449_v58, %v3705_v54 }
 0x372   :  { %v284_v62 = vsel %vm283_vm4, %v282_v60, -inf }
 0x373   :  { %285 = vmax.xlane.f32.xlu1 %v284_v62  ;;  %v451_v63 = vsel %vm283_vm4, %v450_v61, -inf }
 0x374   :  { %452 = vmax.xlane.f32.xlu0 %v451_v63 }
 0x384   :  { %295 = vrot.lane.b32.xlu1 %v195_v45, %s3572_s29 }
 0x388   :  { %685 = vrot.lane.b32.xlu1 %v3678_v43, %s3569_s26 }
 0x38c   :  { %852 = vrot.lane.b32.xlu1 %v3678_v43, %s3568_s25 }
 0x390   :  { %850 = vrot.lane.b32.xlu1 %v3678_v43, %s3570_s27 }
 0x400   :  { %v286_v0 = vpop.xlane.xlu1 %285 }
 0x401   :  { %v287_v1 = vsub.f32 %v282_v60, %v286_v0  ;;  %v453_v2 = vpop.xlane.xlu0 %452  ;;  %v1166_v60 = vrot.slane %v3673_v40, %v1165_v53 }
 0x402   :  { %v454_v3 = vsub.f32 %v450_v61, %v453_v2 }
 0x403   :  { %v288_v4 = vmul.f32 1.442695, %v287_v1 }
 0x404   :  { %v455_v5 = vmul.f32 1.442695, %v454_v3  ;;  %v296_v6 = vpop.permute.xlu1 %295 }
 0x405   :  { %3467 = vpow2.f32 %v288_v4  ;;  %3152 = vmatpush3.msra.mxu1 %v296_v6 }
 0x406   :  { %3161 = vmatprep.subr.mxu1 %v3566_v36  ;;  %3469 = vpow2.f32 %v455_v5 }
 0x408   :  { %v686_v25 = vpop.permute.xlu1 %685 }
 0x40c   :  { %v853_v30 = vpop.permute.xlu1 %852 }
 0x40f   :  { %v3468_v7 = vpop.eup %3467 }
 0x410   :  { %v290_v8 = vsel %vm283_vm4, %v3468_v7, 0.0  ;;  %v3470_v9 = vpop.eup %3469  ;;  %v851_v31 = vpop.permute.xlu1 %850 }
 0x411   :  { %291 = vadd.xlane.f32.xlu0 %v290_v8  ;;  %v457_v10 = vsel %vm283_vm4, %v3470_v9, 0.0 }
 0x415   :  { %458 = vadd.xlane.f32.xlu0 %v457_v10 }
 0x42b   :  { %462 = vrot.lane.b32.xlu0 %v195_v45, %s3573_s30 }
 0x49e   :  { %v292_v15 = vpop.xlane.xlu0 %291 }
 0x49f   :  { %3471 = vrcp.f32 %v292_v15 }
 0x4a2   :  { %v459_v16 = vpop.xlane.xlu0 %458 }
 0x4a3   :  { %3473 = vrcp.f32 %v459_v16 }
 0x4a6   :  { %v463_v21 = vpop.permute.xlu0 %462 }
 0x4a9   :  { %v3472_v17 = vpop.eup %3471 }
 0x4aa   :  { %v294_v18 = vmul.f32 %v3472_v17, %v3468_v7 }
 0x4ac   :  { %3154 = vmatmul.mubr.msk.f32.vlgmr.msra.gmra.mrb[2].mxu1 %vm283_vm4, %v294_v18 }
 0x4ad   :  { %v3474_v22 = vpop.eup %3473  ;;  %3162 = vmatpush3.msra.mxu1 %v463_v21  ;;  %3163 = vmatprep.mubr.msk.f32.mxu1 %vm3567_vm1, %v3566_v36 }
 0x4ae   :  { %v461_v24 = vmul.f32 %v3474_v22, %v3470_v9  ;;  %3374 = vmatprep.subr.bf16.mxu1 %v3574_v13 }
 0x4b0   :  { %3164 = vmatmul.mubr.msk.f32.vlgmr.msra.gmra.mrb[4].mxu1 %vm283_vm4, %v461_v24 }
 0x4b1   :  { %3376 = vmatpush3.bf16.msra.mxu1 %v3739_v23  ;;  %3177 = vmatprep.mubr.msk.f32.mxu1 %vm3567_vm1, %v3566_v36 }
 0x4b2   :  { %3185 = vmatprep.subr.mxu1 %v3566_v36 }
 0x57f   :  { %v367_v26 = vpop.f32.mrb[2].mxu1 }
 0x580   :  { %v3155_v27 = vpop.f32.mrb[3].mxu1  ;;  %3178 = vmatmul.mubr.msk.f32.vlgmr.msra.gmra.mrb[6].mxu1 %vm206_vm2, %v367_v26 }
 0x581   :  { %3187 = vmatprep.mubr.msk.f32.mxu1 %vm3567_vm1, %v3566_v36 }
 0x583   :  { %v534_v28 = vpop.f32.mrb[4].mxu1 }
 0x584   :  { %v3165_v29 = vpop.f32.mrb[5].mxu1  ;;  %3171 = vmatmul.mubr.msk.f32.vlgmr.msra.gmra.mrb[4].mxu0 %vm206_vm2, %v534_v28 }
 0x585   :  { %3181 = vmatpush3.xpose.msk.msra.mxu0 %vm206_vm2, %v686_v25  ;;  %3182 = vmatprep.mubr.msk.f32.mxu0 %vm3567_vm1, %v3566_v36 }
 0x586   :  { %3190 = vmatprep.subr.mxu0 %v3566_v36 }
 0x588   :  { %3183 = vmatmul.mubr.msk.f32.vlgmr.msra.gmra.mrb[6].mxu0 %vm206_vm2, %v3678_v43 }
 0x589   :  { %3191 = vmatpush3.xpose.msk.msra.mxu0 %vm206_vm2, %v853_v30  ;;  %3192 = vmatprep.mubr.msk.f32.mxu0 %vm3567_vm1, %v3566_v36 }
 0x58a   :  { %3377 = vmatprep.subr.bf16.mxu0 %v3574_v13 }
 0x58c   :  { %3193 = vmatmul.mubr.msk.f32.vlgmr.msra.gmra.mrb[8].mxu0 %vm206_vm2, %v851_v31 }
 0x58d   :  { %3379 = vmatpush3.bf16.msra.mxu0 %v3372_v14  ;;  %3204 = vmatprep.mubr.msk.f32.mxu0 %vm3567_vm1, %v3566_v36 }
 0x653   :  { %v680_v32 = vpop.f32.mrb[6].mxu1 }
 0x654   :  { %v3179_v34 = vpop.f32.mrb[7].mxu1 }
 0x657   :  { %v607_v41 = vpop.f32.mrb[4].mxu0 }
 0x658   :  { %v681_v42 = vadd.f32 %v680_v32, %v607_v41  ;;  %v3172_v44 = vpop.f32.mrb[5].mxu0 }
 0x65a   :  { %v1167_v61 = vadd.f32 %v1166_v60, %v681_v42 }
 0x65b   :  { %v757_v46 = vpop.f32.mrb[6].mxu0 }
 0x65c   :  { %v761_v48 = vmul.f32 0.25, %v757_v46  ;;  %v3184_v50 = vpop.f32.mrb[7].mxu0  ;;  %v1169_v62 = vadd.f32 %v1167_v61, %v3653_v33  ;;  %v105_v61 = vld [vmem:[%s4114_s5] sm:$0xff] }
 0x65e   :  { %v762_v52 = vadd.f32 %v761_v48, %v3775_v47  ;;  %v1171_v63 = vsel %vm47_vm0, %v1169_v62, 0.0 }
 0x65f   :  { %v924_v55 = vpop.f32.mrb[8].mxu0 }
 0x660   :  { %v928_v56 = vmul.f32 0.25, %v924_v55  ;;  %v3194_v57 = vpop.f32.mrb[9].mxu0  ;;  %v763_v58 = vsel %vm283_vm4, %v762_v52, -inf  ;;  %v1205_v55 = vsub.s32 3, %v3663_v38 }
 0x661   :  { %764 = vmax.xlane.f32.xlu0 %v763_v58 }
 0x662   :  { %v929_v49 = vadd.f32 %v928_v56, %v3775_v47 }
 0x664   :  { %v930_v59 = vsel %vm283_vm4, %v929_v49, -inf }
 0x665   :  { %931 = vmax.xlane.f32.xlu1 %v930_v59 }
 0x676   :  { %941 = vrot.lane.b32.xlu1 %v3678_v43, %s3573_s30 }
 0x69a   :  { %1172 = vadd.xlane.f32.xlu1 %v1171_v63 }
 0x6ee   :  { %v765_v0 = vpop.xlane.xlu0 %764 }
 0x6ef   :  { %v766_v1 = vsub.f32 %v762_v52, %v765_v0  ;;  %v107_v0 = vld [vmem:[%s4114_s5 + $0x10] sm:$0xff] }
 0x6f1   :  { %v767_v2 = vmul.f32 1.442695, %v766_v1  ;;  %v108_v1 = vld [vmem:[%s4114_s5 + $0x18] sm:$0xff] }
 0x6f2   :  { %v932_v3 = vpop.xlane.xlu1 %931 }
 0x6f3   :  { %3475 = vpow2.f32 %v767_v2  ;;  %v933_v4 = vsub.f32 %v929_v49, %v932_v3  ;;  %v1206_v49 = vrot.slane %v3673_v40, %v1205_v55  ;;  %v3387_v2 = vpack.c.bf16 %v108_v1, %v107_v0 }
 0x6f5   :  { %v934_v5 = vmul.f32 1.442695, %v933_v4 }
 0x6f6   :  { %v942_v15 = vpop.permute.xlu1 %941 }
 0x6f7   :  { %3477 = vpow2.f32 %v934_v5 }
 0x6fd   :  { %v3476_v6 = vpop.eup %3475 }
 0x6fe   :  { %v769_v7 = vsel %vm283_vm4, %v3476_v6, 0.0 }
 0x6ff   :  { %770 = vadd.xlane.f32.xlu0 %v769_v7 }
 0x701   :  { %v3478_v8 = vpop.eup %3477 }
 0x702   :  { %v936_v9 = vsel %vm283_vm4, %v3478_v8, 0.0 }
 0x703   :  { %937 = vadd.xlane.f32.xlu0 %v936_v9 }
 0x719   :  { %774 = vrot.lane.b32.xlu0 %v3678_v43, %s3572_s29 }
 0x727   :  { %v1173_v21 = vpop.xlane.xlu1 %1172 }
 0x728   :  { %v1177_v25 = vmul.f32 0.03125, %v1173_v21  ;;  %v1211_v21 = vsub.s32 4, %v3663_v38 }
 0x72a   :  { %v1179_v29 = vsub.f32 %v1169_v62, %v1177_v25  ;;  %v106_v62 = vld [vmem:[%s4114_s5 + $0x8] sm:$0xff] }
 0x72b   :  { %v3383_v63 = vpack.c.bf16 %v106_v62, %v105_v61 }
 0x72c   :  { %v1181_v32 = vmul.f32 %v1179_v29, %v1179_v29 }
 0x72d   :  { %3384 = vmatprep.subr.bf16.mxu0 %v3383_v63 }
 0x72e   :  { %v1183_v34 = vsel %vm47_vm0, %v1181_v32, 0.0 }
 0x78c   :  { %v771_v33 = vpop.xlane.xlu0 %770 }
 0x78d   :  { %3479 = vrcp.f32 %v771_v33  ;;  %v109_v33 = vld [vmem:[%s4115_s6] sm:$0xff] }
 0x790   :  { %v938_v10 = vpop.xlane.xlu0 %937 }
 0x791   :  { %3481 = vrcp.f32 %v938_v10  ;;  %v110_v10 = vld [vmem:[%s4115_s6 + $0x8] sm:$0xff] }
 0x794   :  { %v775_v11 = vpop.permute.xlu0 %774 }
 0x795   :  { %3186 = vmatpush3.msra.mxu1 %v775_v11  ;;  %v3391_v11 = vpack.c.bf16 %v110_v10, %v109_v33 }
 0x796   :  { %3195 = vmatprep.subr.mxu1 %v3566_v36 }
 0x797   :  { %v3480_v12 = vpop.eup %3479 }
 0x798   :  { %v773_v14 = vmul.f32 %v3480_v12, %v3476_v6  ;;  %v111_v12 = vld [vmem:[%s4115_s6 + $0x10] sm:$0xff] }
 0x79a   :  { %3188 = vmatmul.mubr.msk.f32.vlgmr.msra.gmra.mrb[8].mxu1 %vm283_vm4, %v773_v14  ;;  %v112_v14 = vld [vmem:[%s4115_s6 + $0x18] sm:$0xff] }
 0x79b   :  { %v3482_v16 = vpop.eup %3481  ;;  %3196 = vmatpush3.msra.mxu1 %v942_v15  ;;  %3197 = vmatprep.mubr.msk.f32.mxu1 %vm3567_vm1, %v3566_v36  ;;  %v3395_v15 = vpack.c.bf16 %v112_v14, %v111_v12 }
 0x79c   :  { %v940_v17 = vmul.f32 %v3482_v16, %v3478_v8  ;;  %3380 = vmatprep.subr.bf16.mxu1 %v3574_v13  ;;  %v113_v16 = vld [vmem:[%s4115_s6 + $0x20] sm:$0xff] }
 0x79e   :  { %3198 = vmatmul.mubr.msk.f32.vlgmr.msra.gmra.mrb[10].mxu1 %vm283_vm4, %v940_v17  ;;  %v114_v17 = vld [vmem:[%s4115_s6 + $0x28] sm:$0xff] }
 0x79f   :  { %3382 = vmatpush3.bf16.msra.mxu1 %v3739_v23  ;;  %3211 = vmatprep.mubr.msk.f32.mxu1 %vm3567_vm1, %v3566_v36 }
 0x7a0   :  { %3392 = vmatprep.subr.bf16.mxu1 %v3391_v11 }
 0x86d   :  { %v846_v43 = vpop.f32.mrb[8].mxu1 }
 0x86e   :  { %v3189_v18 = vpop.f32.mrb[9].mxu1  ;;  %3212 = vmatmul.mubr.msk.f32.vlgmr.msra.gmra.mrb[12].mxu1 %vm206_vm2, %v846_v43  ;;  %v3399_v43 = vpack.c.bf16 %v114_v17, %v113_v16  ;;  %v2988_v17 = vld [vmem:[%s4112_s3 + $0x30] sm:$0xff] }
 0x86f   :  { %3394 = vmatpush3.bf16.msra.mxu1 %v3391_v11  ;;  %v115_v18 = vld [vmem:[%s4115_s6 + $0x30] sm:$0xff] }
 0x870   :  { %3396 = vmatprep.subr.bf16.mxu1 %v3395_v15 }
 0x871   :  { %v1013_v19 = vpop.f32.mrb[10].mxu1 }
 0x872   :  { %v3199_v20 = vpop.f32.mrb[11].mxu1  ;;  %3205 = vmatmul.mubr.msk.f32.vlgmr.msra.gmra.mrb[10].mxu0 %vm206_vm2, %v1013_v19  ;;  %v116_v19 = vld [vmem:[%s4115_s6 + $0x38] sm:$0xff] }
 0x873   :  { %3386 = vmatpush3.bf16.msra.mxu0 %v3383_v63  ;;  %3398 = vmatpush3.bf16.msra.mxu1 %v3395_v15  ;;  %v3403_v20 = vpack.c.bf16 %v116_v19, %v115_v18  ;;  %v2987_v15 = vld [vmem:[%s4112_s3 + $0x28] sm:$0xff] }
 0x874   :  { %3388 = vmatprep.subr.bf16.mxu0 %v3387_v2  ;;  %3400 = vmatprep.subr.bf16.mxu1 %v3399_v43 }
 0x877   :  { %3390 = vmatpush3.bf16.msra.mxu0 %v3387_v2  ;;  %3402 = vmatpush3.bf16.msra.mxu1 %v3399_v43  ;;  %v2989_v43 = vld [vmem:[%s4112_s3 + $0x38] sm:$0xff] }
 0x878   :  { %3404 = vmatprep.subr.bf16.mxu1 %v3403_v20  ;;  %v3411_v18 = vpack.c.bf16 %v2989_v43, %v2988_v17 }
 0x87b   :  { %3406 = vmatpush3.bf16.msra.mxu1 %v3403_v20 }
 0x87c   :  { %3260 = vmatprep.subr.mxu1 %v3566_v36 }
 0x941   :  { %v1159_v22 = vpop.f32.mrb[12].mxu1 }
 0x942   :  { %v3213_v24 = vpop.f32.mrb[13].mxu1 }
 0x945   :  { %v1086_v26 = vpop.f32.mrb[10].mxu0 }
 0x946   :  { %v1160_v27 = vadd.f32 %v1159_v22, %v1086_v26  ;;  %v3206_v28 = vpop.f32.mrb[11].mxu0  ;;  %v1212_v22 = vrot.slane %v3673_v40, %v1211_v21 }
 0x948   :  { %v1168_v23 = vadd.f32 %v1166_v60, %v1160_v27 }
 0x94a   :  { %v1170_v30 = vadd.f32 %v1168_v23, %v3657_v35  ;;  %v1199_v35 = vsub.s32 2, %v3663_v38 }
 0x94c   :  { %v1174_v31 = vsel %vm47_vm0, %v1170_v30, 0.0  ;;  %v1200_v56 = vrot.slane %v3673_v40, %v1199_v35 }
 0x94d   :  { %1175 = vadd.xlane.f32.xlu0 %v1174_v31 }
 0x951   :  { %1184 = vadd.xlane.f32.xlu0 %v1183_v34 }
 0x9da   :  { %v1176_v37 = vpop.xlane.xlu0 %1175 }
 0x9db   :  { %v1178_v41 = vmul.f32 0.03125, %v1176_v37 }
 0x9dd   :  { %v1180_v42 = vsub.f32 %v1170_v30, %v1178_v41 }
 0x9de   :  { %v1185_v44 = vpop.xlane.xlu0 %1184 }
 0x9df   :  { %v1189_v46 = vmul.f32 0.03125, %v1185_v44  ;;  %v1182_v48 = vmul.f32 %v1180_v42, %v1180_v42 }
 0x9e1   :  { %v1191_v50 = vadd.f32 1e-12, %v1189_v46  ;;  %v1186_v52 = vsel %vm47_vm0, %v1182_v48, 0.0 }
 0x9e2   :  { %1187 = vadd.xlane.f32.xlu1 %v1186_v52 }
 0x9e3   :  { %3483 = vrsqrt.f32 %v1191_v50 }
 0x9ed   :  { %v3484_v57 = vpop.eup %3483 }
 0x9ee   :  { %v1195_v58 = vmul.f32 %v3484_v57, %v1179_v29 }
 0x9f0   :  { %v1201_v59 = vmul.f32 %v1200_v56, %v1195_v58 }
 0x9f2   :  { %v3816_v60 = vadd.f32 %v1206_v49, %v1201_v59 }
 0x9f4   :  { %3222 = vmatprep.mubr.msk.f32.mxu0 %vm47_vm0, %v3816_v60 }
 0xa6f   :  { %v1188_v3 = vpop.xlane.xlu1 %1187 }
 0xa70   :  { %v1190_v4 = vmul.f32 0.03125, %v1188_v3 }
 0xa72   :  { %v1192_v5 = vadd.f32 1e-12, %v1190_v4 }
 0xa74   :  { %3485 = vrsqrt.f32 %v1192_v5 }
 0xa7e   :  { %v3486_v6 = vpop.eup %3485 }
 0xa7f   :  { %v1196_v7 = vmul.f32 %v3486_v6, %v1180_v42 }
 0xa81   :  { %v1202_v8 = vmul.f32 %v1200_v56, %v1196_v7 }
 0xa83   :  { %v1208_v9 = vadd.f32 %v1206_v49, %v1202_v8  ;;  %v1314_v49 = vsub.s32 5, %v3663_v38 }
 0xa85   :  { %3223 = vmatmul.mubr.msk.f32.vlgmr.msra.gmra.mrb[12].mxu0 %vm47_vm0, %v1208_v9  ;;  %v1315_v59 = vrot.slane %v3673_v40, %v1314_v49 }
 0xb58   :  { %v3224_v24 = vpop.f32.mrb[12].mxu0 }
 0xb59   :  { %v1291_v25 = vadd.f32 %v3224_v24, %v1212_v22  ;;  %v1285_v26 = vpop.f32.mrb[13].mxu0 }
 0xb5a   :  { %v1286_v27 = vadd.f32 %v1285_v26, %v1212_v22 }
 0xb5b   :  { %v1295_v28 = vmul.f32 %v1291_v25, %v1291_v25 }
 0xb5c   :  { %v1294_v29 = vmul.f32 %v1286_v27, %v1286_v27 }
 0xb5d   :  { %v1297_v23 = vmul.f32 %v1295_v28, %v1291_v25  ;;  %v1434_v28 = vsub.s32 7, %v3663_v38 }
 0xb5e   :  { %v1296_v30 = vmul.f32 %v1294_v29, %v1286_v27 }
 0xb5f   :  { %v1299_v31 = vmul.f32 0.044715, %v1297_v23 }
 0xb60   :  { %v1298_v32 = vmul.f32 0.044715, %v1296_v30 }
 0xb61   :  { %v1301_v34 = vadd.f32 %v1299_v31, %v1291_v25 }
 0xb62   :  { %v1300_v37 = vadd.f32 %v1298_v32, %v1286_v27 }
 0xb63   :  { %v1303_v41 = vmul.f32 0.7978846, %v1301_v34  ;;  %v1435_v34 = vrot.slane %v3673_v40, %v1434_v28 }
 0xb64   :  { %v1302_v42 = vmul.f32 0.7978846, %v1300_v37 }
 0xb65   :  { %3487 = vtanh.f32 %v1303_v41 }
 0xb66   :  { %3489 = vtanh.f32 %v1302_v42 }
 0xb6f   :  { %v3488_v44 = vpop.eup %3487 }
 0xb70   :  { %v3490_v46 = vpop.eup %3489  ;;  %v1307_v48 = vadd.f32 1.0, %v3488_v44 }
 0xb71   :  { %v1306_v50 = vadd.f32 1.0, %v3490_v46  ;;  %v3909_v46 = vld [vmem:[%s4116_s7 + $0x8] sm:$0xff] }
 0xb72   :  { %v1309_v52 = vmul.f32 0.5, %v1307_v48 }
 0xb73   :  { %v1308_v56 = vmul.f32 0.5, %v1306_v50 }
 0xb74   :  { %v1311_v58 = vmul.f32 %v1309_v52, %v1291_v25 }
 0xb75   :  { %v1310_v57 = vmul.f32 %v1308_v56, %v1286_v27  ;;  %v1428_v27 = vsub.s32 6, %v3663_v38  ;;  %v2860_v38 = vsel %vm3768_vm5, 1.0, %v3566_v36 }
 0xb77   :  { %3241 = vmatprep.mubr.msk.f32.mxu1 %vm1316_vm6, %v1310_v57  ;;  %v1429_v29 = vrot.slane %v3673_v40, %v1428_v27  ;;  %v1467_v40 = vrot.slane %v3909_v46, %v120_v39 }
 0xb78   :  { %3242 = vmatmul.mubr.msk.f32.vlgmr.msra.gmra.mrb[14].mxu1 %vm1316_vm6, %v1311_v58 }
 0xb79   :  { %3262 = vmatprep.mubr.msk.f32.mxu1 %vm3567_vm1, %v3566_v36 }
 0xc4b   :  { %v3243_v61 = vpop.f32.mrb[14].mxu1 }
 0xc4c   :  { %v1395_v62 = vadd.f32 %v3243_v61, %v1315_v59  ;;  %v1389_v63 = vpop.f32.mrb[15].mxu1 }
 0xc4d   :  { %v1390_v0 = vadd.f32 %v1389_v63, %v1315_v59 }
 0xc4e   :  { %v1399_v1 = vadd.f32 %v1395_v62, %v1208_v9 }
 0xc4f   :  { %v1398_v2 = vadd.f32 %v1390_v0, %v3816_v60  ;;  %v2986_v60 = vld [vmem:[%s4112_s3 + $0x20] sm:$0xff] }
 0xc50   :  { %v1403_v3 = vsel %vm47_vm0, %v1399_v1, 0.0  ;;  %v3407_v16 = vpack.c.bf16 %v2987_v15, %v2986_v60  ;;  %v2992_v15 = vld [vmem:[%s4113_s4 + $0x30] sm:$0xff] }
 0xc51   :  { %1404 = vadd.xlane.f32.xlu1 %v1403_v3  ;;  %v1400_v4 = vsel %vm47_vm0, %v1398_v2, 0.0 }
 0xc52   :  { %1401 = vadd.xlane.f32.xlu0 %v1400_v4  ;;  %3408 = vmatprep.subr.bf16.mxu0 %v3407_v16 }
 0xc53   :  { %3410 = vmatpush3.bf16.msra.mxu0 %v3407_v16  ;;  %v2993_v16 = vld [vmem:[%s4113_s4 + $0x38] sm:$0xff] }
 0xc54   :  { %3412 = vmatprep.subr.bf16.mxu0 %v3411_v18  ;;  %v3416_v17 = vpack.c.bf16 %v2993_v16, %v2992_v15 }
 0xc57   :  { %3414 = vmatpush3.bf16.msra.mxu0 %v3411_v18 }
 0xc58   :  { %3255 = vmatprep.subr.mxu0 %v3566_v36 }
 0xcde   :  { %v1405_v5 = vpop.xlane.xlu1 %1404 }
 0xcdf   :  { %v1407_v6 = vmul.f32 0.03125, %v1405_v5  ;;  %v1402_v7 = vpop.xlane.xlu0 %1401 }
 0xce0   :  { %v1406_v8 = vmul.f32 0.03125, %v1402_v7 }
 0xce1   :  { %v1409_v33 = vsub.f32 %v1399_v1, %v1407_v6 }
 0xce2   :  { %v1408_v10 = vsub.f32 %v1398_v2, %v1406_v8 }
 0xce3   :  { %v1411_v11 = vmul.f32 %v1409_v33, %v1409_v33 }
 0xce4   :  { %v1410_v12 = vmul.f32 %v1408_v10, %v1408_v10 }
 0xce5   :  { %v1415_v14 = vsel %vm47_vm0, %v1411_v11, 0.0 }
 0xce6   :  { %1416 = vadd.xlane.f32.xlu1 %v1415_v14  ;;  %v1412_v9 = vsel %vm47_vm0, %v1410_v12, 0.0 }
 0xce7   :  { %1413 = vadd.xlane.f32.xlu0 %v1412_v9 }
 0xd73   :  { %v1417_v19 = vpop.xlane.xlu1 %1416 }
 0xd74   :  { %v1419_v20 = vmul.f32 0.03125, %v1417_v19  ;;  %v1414_v22 = vpop.xlane.xlu0 %1413 }
 0xd75   :  { %v1418_v24 = vmul.f32 0.03125, %v1414_v22  ;;  %v2990_v22 = vld [vmem:[%s4113_s4 + $0x20] sm:$0xff] }
 0xd76   :  { %v1421_v25 = vadd.f32 1e-12, %v1419_v20 }
 0xd77   :  { %v1420_v26 = vadd.f32 1e-12, %v1418_v24  ;;  %v2991_v24 = vld [vmem:[%s4113_s4 + $0x28] sm:$0xff]  ;;  %s2856_s4 = smax.f32 %s3575_s14, %s2855_s13 }
 0xd78   :  { %3491 = vrsqrt.f32 %v1421_v25 }
 0xd79   :  { %3493 = vrsqrt.f32 %v1420_v26 }
 0xd82   :  { %v3492_v23 = vpop.eup %3491 }
 0xd83   :  { %v3494_v30 = vpop.eup %3493  ;;  %v1425_v31 = vmul.f32 %v3492_v23, %v1409_v33 }
 0xd84   :  { %v1424_v32 = vmul.f32 %v3494_v30, %v1408_v10 }
 0xd85   :  { %v1431_v37 = vmul.f32 %v1429_v29, %v1425_v31 }
 0xd86   :  { %v1430_v41 = vmul.f32 %v1429_v29, %v1424_v32  ;;  %v3960_v29 = vpack.c.bf16 %v2991_v24, %v2990_v22 }
 0xd87   :  { %v3898_v44 = vadd.f32 %v1435_v34, %v1431_v37 }
 0xd88   :  { %v3896_v42 = vadd.f32 %v1435_v34, %v1430_v41 }
 0xd8a   :  { %3252 = vmatprep.mubr.msk.f32.mxu0 %vm47_vm0, %v3896_v42 }
 0xd8b   :  { %3253 = vmatmul.mubr.msk.f32.vlgmr.msra.gmra.mrb[14].mxu0 %vm47_vm0, %v3898_v44 }
 0xd8c   :  { %3257 = vmatprep.mubr.msk.f32.mxu0 %vm3567_vm1, %v3566_v36 }
 0xe5e   :  { %v3254_v48 = vpop.f32.mrb[14].mxu0 }
 0xe5f   :  { %v3914_v50 = vadd.f32 %v3254_v48, %v1467_v40  ;;  %v1540_v52 = vpop.f32.mrb[15].mxu0 }
 0xe60   :  { %v1541_v56 = vadd.f32 %v1540_v52, %v1467_v40 }
 0xe62   :  { %1717 = vrot.lane.b32.xlu1 %v1541_v56, %s3568_s25  ;;  %1550 = vrot.lane.b32.xlu0 %v1541_v56, %s3569_s26 }
 0xe66   :  { %1715 = vrot.lane.b32.xlu1 %v1541_v56, %s3570_s27 }
 0xed4   :  { %v1551_v57 = vpop.permute.xlu0 %1550  ;;  %v1718_v58 = vpop.permute.xlu1 %1717 }
 0xed5   :  { %3256 = vmatpush3.xpose.msk.msra.mxu0 %vm206_vm2, %v1551_v57 }
 0xed6   :  { %3265 = vmatprep.subr.mxu0 %v3566_v36 }
 0xed8   :  { %3258 = vmatmul.mubr.msk.f32.vlgmr.msra.gmra.mrb[16].mxu0 %vm206_vm2, %v1541_v56  ;;  %v1716_v39 = vpop.permute.xlu1 %1715 }
 0xed9   :  { %3266 = vmatpush3.xpose.msk.msra.mxu0 %vm206_vm2, %v1718_v58  ;;  %3267 = vmatprep.mubr.msk.f32.mxu0 %vm3567_vm1, %v3566_v36 }
 0xeda   :  { %3415 = vmatprep.subr.bf16.mxu0 %v3574_v13 }
 0xedc   :  { %3268 = vmatmul.mubr.msk.f32.vlgmr.msra.gmra.mrb[18].mxu0 %vm206_vm2, %v1716_v39 }
 0xedd   :  { %3279 = vmatprep.mubr.msk.f32.mxu0 %vm3567_vm1, %v3566_v36  ;;  %3417 = vmatpush3.bf16.msra.mxu0 %v3416_v17 }
 0xede   :  { %3289 = vmatprep.subr.mxu0 %v3566_v36 }
 0xfab   :  { %v1622_v59 = vpop.f32.mrb[16].mxu0 }
 0xfac   :  { %v1626_v61 = vmul.f32 0.25, %v1622_v59  ;;  %v3259_v62 = vpop.f32.mrb[17].mxu0 }
 0xfae   :  { %v1627_v63 = vadd.f32 %v1626_v61, %v3705_v54 }
 0xfaf   :  { %v1789_v0 = vpop.f32.mrb[18].mxu0 }
 0xfb0   :  { %v1793_v1 = vmul.f32 0.25, %v1789_v0  ;;  %v3269_v2 = vpop.f32.mrb[19].mxu0  ;;  %v1628_v3 = vsel %vm283_vm4, %v1627_v63, -inf }
 0xfb1   :  { %1629 = vmax.xlane.f32.xlu1 %v1628_v3 }
 0xfb2   :  { %v1794_v4 = vadd.f32 %v1793_v1, %v3705_v54 }
 0xfb4   :  { %v1795_v5 = vsel %vm283_vm4, %v1794_v4, -inf }
 0xfb5   :  { %1796 = vmax.xlane.f32.xlu0 %v1795_v5  ;;  %v2510_v5 = vrot.slane %v3909_v46, %v1165_v53 }
 0xfc2   :  { %1639 = vrot.lane.b32.xlu1 %v1541_v56, %s3572_s29 }
 0xfc6   :  { %2029 = vrot.lane.b32.xlu1 %v3914_v50, %s3569_s26 }
 0xfca   :  { %2196 = vrot.lane.b32.xlu1 %v3914_v50, %s3568_s25 }
 0xfce   :  { %2194 = vrot.lane.b32.xlu1 %v3914_v50, %s3570_s27 }
0x103e   :  { %v1630_v6 = vpop.xlane.xlu1 %1629 }
0x103f   :  { %v1631_v7 = vsub.f32 %v1627_v63, %v1630_v6 }
0x1041   :  { %v1632_v8 = vmul.f32 1.442695, %v1631_v7 }
0x1042   :  { %v1640_v33 = vpop.permute.xlu1 %1639  ;;  %v1797_v10 = vpop.xlane.xlu0 %1796 }
0x1043   :  { %3495 = vpow2.f32 %v1632_v8  ;;  %v1798_v54 = vsub.f32 %v1794_v4, %v1797_v10  ;;  %3261 = vmatpush3.msra.mxu1 %v1640_v33 }
0x1044   :  { %3270 = vmatprep.subr.mxu1 %v3566_v36 }
0x1045   :  { %v1799_v11 = vmul.f32 1.442695, %v1798_v54 }
0x1046   :  { %v2030_v30 = vpop.permute.xlu1 %2029 }
0x1047   :  { %3497 = vpow2.f32 %v1799_v11 }
0x104a   :  { %v2197_v41 = vpop.permute.xlu1 %2196 }
0x104d   :  { %v3496_v12 = vpop.eup %3495 }
0x104e   :  { %v1634_v14 = vsel %vm283_vm4, %v3496_v12, 0.0  ;;  %v2195_v40 = vpop.permute.xlu1 %2194 }
0x104f   :  { %1635 = vadd.xlane.f32.xlu0 %v1634_v14 }
0x1051   :  { %v3498_v9 = vpop.eup %3497 }
0x1052   :  { %v1801_v60 = vsel %vm283_vm4, %v3498_v9, 0.0 }
0x1053   :  { %1802 = vadd.xlane.f32.xlu0 %v1801_v60 }
0x1069   :  { %1806 = vrot.lane.b32.xlu0 %v1541_v56, %s3573_s30 }
0x10dc   :  { %v1636_v43 = vpop.xlane.xlu0 %1635 }
0x10dd   :  { %3499 = vrcp.f32 %v1636_v43 }
0x10e0   :  { %v1803_v18 = vpop.xlane.xlu0 %1802 }
0x10e1   :  { %3501 = vrcp.f32 %v1803_v18 }
0x10e4   :  { %v1807_v25 = vpop.permute.xlu0 %1806 }
0x10e7   :  { %v3500_v19 = vpop.eup %3499 }
0x10e8   :  { %v1638_v20 = vmul.f32 %v3500_v19, %v3496_v12 }
0x10ea   :  { %3263 = vmatmul.mubr.msk.f32.vlgmr.msra.gmra.mrb[16].mxu1 %vm283_vm4, %v1638_v20 }
0x10eb   :  { %v3502_v26 = vpop.eup %3501  ;;  %3271 = vmatpush3.msra.mxu1 %v1807_v25  ;;  %3272 = vmatprep.mubr.msk.f32.mxu1 %vm3567_vm1, %v3566_v36 }
0x10ec   :  { %v1805_v23 = vmul.f32 %v3502_v26, %v3498_v9  ;;  %3418 = vmatprep.subr.bf16.mxu1 %v3574_v13 }
0x10ee   :  { %3273 = vmatmul.mubr.msk.f32.vlgmr.msra.gmra.mrb[18].mxu1 %vm283_vm4, %v1805_v23 }
0x10ef   :  { %3420 = vmatpush3.bf16.msra.mxu1 %v3960_v29  ;;  %3286 = vmatprep.mubr.msk.f32.mxu1 %vm3567_vm1, %v3566_v36 }
0x10f0   :  { %3294 = vmatprep.subr.mxu1 %v3566_v36 }
0x11bd   :  { %v1711_v31 = vpop.f32.mrb[16].mxu1 }
0x11be   :  { %v3264_v32 = vpop.f32.mrb[17].mxu1  ;;  %3287 = vmatmul.mubr.msk.f32.vlgmr.msra.gmra.mrb[20].mxu1 %vm206_vm2, %v1711_v31 }
0x11bf   :  { %3296 = vmatprep.mubr.msk.f32.mxu1 %vm3567_vm1, %v3566_v36 }
0x11c1   :  { %v1878_v34 = vpop.f32.mrb[18].mxu1 }
0x11c2   :  { %v3274_v37 = vpop.f32.mrb[19].mxu1  ;;  %3280 = vmatmul.mubr.msk.f32.vlgmr.msra.gmra.mrb[20].mxu0 %vm206_vm2, %v1878_v34 }
0x11c3   :  { %3290 = vmatpush3.xpose.msk.msra.mxu0 %vm206_vm2, %v2030_v30  ;;  %3291 = vmatprep.mubr.msk.f32.mxu0 %vm3567_vm1, %v3566_v36 }
0x11c4   :  { %3299 = vmatprep.subr.mxu0 %v3566_v36 }
0x11c6   :  { %3292 = vmatmul.mubr.msk.f32.vlgmr.msra.gmra.mrb[22].mxu0 %vm206_vm2, %v3914_v50 }
0x11c7   :  { %3300 = vmatpush3.xpose.msk.msra.mxu0 %vm206_vm2, %v2197_v41  ;;  %3301 = vmatprep.mubr.msk.f32.mxu0 %vm3567_vm1, %v3566_v36 }
0x11c8   :  { %3421 = vmatprep.subr.bf16.mxu0 %v3574_v13 }
0x11ca   :  { %3302 = vmatmul.mubr.msk.f32.vlgmr.msra.gmra.mrb[24].mxu0 %vm206_vm2, %v2195_v40 }
0x11cb   :  { %3423 = vmatpush3.bf16.msra.mxu0 %v3416_v17  ;;  %3313 = vmatprep.mubr.msk.f32.mxu0 %vm3567_vm1, %v3566_v36 }
0x1291   :  { %v2024_v48 = vpop.f32.mrb[20].mxu1 }
0x1292   :  { %v3288_v52 = vpop.f32.mrb[21].mxu1 }
0x1295   :  { %v1951_v56 = vpop.f32.mrb[20].mxu0 }
0x1296   :  { %v2025_v57 = vadd.f32 %v2024_v48, %v1951_v56  ;;  %v3281_v58 = vpop.f32.mrb[21].mxu0 }
0x1298   :  { %v2511_v6 = vadd.f32 %v2510_v5, %v2025_v57 }
0x1299   :  { %v2101_v39 = vpop.f32.mrb[22].mxu0 }
0x129a   :  { %v2105_v59 = vmul.f32 0.25, %v2101_v39  ;;  %v3293_v61 = vpop.f32.mrb[23].mxu0  ;;  %v2513_v7 = vadd.f32 %v2511_v6, %v3896_v42 }
0x129c   :  { %v2106_v62 = vadd.f32 %v2105_v59, %v3775_v47  ;;  %v2515_v8 = vsel %vm47_vm0, %v2513_v7, 0.0 }
0x129d   :  { %v2268_v63 = vpop.f32.mrb[24].mxu0 }
0x129e   :  { %v2272_v0 = vmul.f32 0.25, %v2268_v63  ;;  %v3303_v1 = vpop.f32.mrb[25].mxu0  ;;  %v2107_v2 = vsel %vm283_vm4, %v2106_v62, -inf }
0x129f   :  { %2108 = vmax.xlane.f32.xlu0 %v2107_v2  ;;  %v2550_v2 = vrot.slane %v3909_v46, %v1205_v55  ;;  %v2996_v55 = vld [vmem:[%s4114_s5 + $0x30] sm:$0xff] }
0x12a0   :  { %v2273_v3 = vadd.f32 %v2272_v0, %v3775_v47 }
0x12a2   :  { %v2274_v4 = vsel %vm283_vm4, %v2273_v3, -inf }
0x12a3   :  { %2275 = vmax.xlane.f32.xlu1 %v2274_v4 }
0x12b4   :  { %2285 = vrot.lane.b32.xlu1 %v3914_v50, %s3573_s30 }
0x12d8   :  { %2516 = vadd.xlane.f32.xlu1 %v2515_v8 }
0x132c   :  { %v2109_v33 = vpop.xlane.xlu0 %2108 }
0x132d   :  { %v2110_v10 = vsub.f32 %v2106_v62, %v2109_v33 }
0x132f   :  { %v2111_v54 = vmul.f32 1.442695, %v2110_v10 }
0x1330   :  { %v2276_v47 = vpop.xlane.xlu1 %2275 }
0x1331   :  { %3503 = vpow2.f32 %v2111_v54  ;;  %v2277_v11 = vsub.f32 %v2273_v3, %v2276_v47 }
0x1333   :  { %v2278_v12 = vmul.f32 1.442695, %v2277_v11 }
0x1334   :  { %v2286_v18 = vpop.permute.xlu1 %2285 }
0x1335   :  { %3505 = vpow2.f32 %v2278_v12 }
0x133b   :  { %v3504_v14 = vpop.eup %3503 }
0x133c   :  { %v2113_v9 = vsel %vm283_vm4, %v3504_v14, 0.0 }
0x133d   :  { %2114 = vadd.xlane.f32.xlu0 %v2113_v9  ;;  %v2998_v9 = vld [vmem:[%s4115_s6 + $0x40] sm:$0xff] }
0x133f   :  { %v3506_v60 = vpop.eup %3505 }
0x1340   :  { %v2280_v53 = vsel %vm283_vm4, %v3506_v60, 0.0 }
0x1341   :  { %2281 = vadd.xlane.f32.xlu0 %v2280_v53 }
0x1357   :  { %2118 = vrot.lane.b32.xlu0 %v3914_v50, %s3572_s29  ;;  %s3576_s29 = smov [#allocation5]  }
0x1358   :  { %s2952_s30 = sshll.u32 %s3576_s29, 4  ;;  %s2953_s30 = int_to_ptr.vmem [resolvable:$true] %s2952_s30 }
0x1359   :  { %s3539_s28 = scalar_lea.vmem %s2953_s30, 32  ;;  %p3544_p6 = scmp.lt.s32.totalorder %s2953_s30, %s2953_s30 }
0x135a   :  { %p3540_p5 = scmp.ne.s32.totalorder %s2953_s30, %s3539_s28  ;;  %p3545_p7 = scmp.lt.s32.totalorder %s3539_s28, %s3539_s28 }
0x135c   :  { %p3546_p8 = por %p3545_p7, %p3544_p6 }
0x135e   :  { %p3547_p9 = pnand %p3546_p8, %p3540_p5 }
0x1365   :  { %v2517_v26 = vpop.xlane.xlu1 %2516 }
0x1366   :  { %v2521_v31 = vmul.f32 0.03125, %v2517_v26 }
0x1368   :  { %v2523_v37 = vsub.f32 %v2513_v7, %v2521_v31  ;;  %v2997_v7 = vld [vmem:[%s4114_s5 + $0x38] sm:$0xff] }
0x1369   :  { %v3431_v8 = vpack.c.bf16 %v2997_v7, %v2996_v55 }
0x136a   :  { %v2525_v48 = vmul.f32 %v2523_v37, %v2523_v37 }
0x136c   :  { %v2527_v52 = vsel %vm47_vm0, %v2525_v48, 0.0 }
0x13ca   :  { %v2115_v42 = vpop.xlane.xlu0 %2114 }
0x13cb   :  { %3507 = vrcp.f32 %v2115_v42  ;;  %v3000_v42 = vld [vmem:[%s4115_s6 + $0x50] sm:$0xff] }
0x13ce   :  { %v2282_v15 = vpop.xlane.xlu0 %2281 }
0x13cf   :  { %3509 = vrcp.f32 %v2282_v15  ;;  %v3001_v15 = vld [vmem:[%s4115_s6 + $0x58] sm:$0xff] }
0x13d2   :  { %v2119_v16 = vpop.permute.xlu0 %2118 }
0x13d3   :  { %3295 = vmatpush3.msra.mxu1 %v2119_v16  ;;  %v3439_v16 = vpack.c.bf16 %v3001_v15, %v3000_v42  ;;  %v2772_v15 = vrot.slane %v3909_v46, %v1428_v27  ;;  %v2857_v27 = vstv %s2856_s4 }
0x13d4   :  { %3304 = vmatprep.subr.mxu1 %v3566_v36 }
0x13d5   :  { %v3508_v17 = vpop.eup %3507 }
0x13d6   :  { %v2117_v43 = vmul.f32 %v3508_v17, %v3504_v14  ;;  %v3002_v17 = vld [vmem:[%s4115_s6 + $0x60] sm:$0xff] }
0x13d8   :  { %3297 = vmatmul.mubr.msk.f32.vlgmr.msra.gmra.mrb[22].mxu1 %vm283_vm4, %v2117_v43  ;;  %v3003_v43 = vld [vmem:[%s4115_s6 + $0x68] sm:$0xff] }
0x13d9   :  { %v3510_v19 = vpop.eup %3509  ;;  %3305 = vmatpush3.msra.mxu1 %v2286_v18  ;;  %3306 = vmatprep.mubr.msk.f32.mxu1 %vm3567_vm1, %v3566_v36  ;;  %v3443_v18 = vpack.c.bf16 %v3003_v43, %v3002_v17 }
0x13da   :  { %v2284_v20 = vmul.f32 %v3510_v19, %v3506_v60  ;;  %3424 = vmatprep.subr.bf16.mxu1 %v3574_v13  ;;  %v2999_v60 = vld [vmem:[%s4115_s6 + $0x48] sm:$0xff]  ;;  %v3004_v19 = vld [vmem:[%s4115_s6 + $0x70] sm:$0xff] }
0x13db   :  { %v3435_v53 = vpack.c.bf16 %v2999_v60, %v2998_v9 }
0x13dc   :  { %3307 = vmatmul.mubr.msk.f32.vlgmr.msra.gmra.mrb[24].mxu1 %vm283_vm4, %v2284_v20  ;;  %v3005_v20 = vld [vmem:[%s4115_s6 + $0x78] sm:$0xff]  ;;  %s2934_s6 = scvt.s32.f32 %s3764_s15 }
0x13dd   :  { %3426 = vmatpush3.bf16.msra.mxu1 %v3960_v29  ;;  %3320 = vmatprep.mubr.msk.f32.mxu1 %vm3567_vm1, %v3566_v36 }
0x13de   :  { %3436 = vmatprep.subr.bf16.mxu1 %v3435_v53  ;;  %s2935_s16 = smax.f32 %s3575_s14, %s2934_s6 }
0x13df   :  { %v2936_v51 = vstv %s2935_s16 }
0x14ab   :  { %v2190_v50 = vpop.f32.mrb[22].mxu1 }
0x14ac   :  { %v3298_v22 = vpop.f32.mrb[23].mxu1  ;;  %3321 = vmatmul.mubr.msk.f32.vlgmr.msra.gmra.mrb[26].mxu1 %vm206_vm2, %v2190_v50  ;;  %v3447_v50 = vpack.c.bf16 %v3005_v20, %v3004_v19 }
0x14ad   :  { %3438 = vmatpush3.bf16.msra.mxu1 %v3435_v53  ;;  %v2556_v22 = vrot.slane %v3909_v46, %v1211_v21 }
0x14ae   :  { %3440 = vmatprep.subr.bf16.mxu1 %v3439_v16 }
0x14af   :  { %v2357_v24 = vpop.f32.mrb[24].mxu1 }
0x14b0   :  { %v3308_v25 = vpop.f32.mrb[25].mxu1  ;;  %3314 = vmatmul.mubr.msk.f32.vlgmr.msra.gmra.mrb[26].mxu0 %vm206_vm2, %v2357_v24 }
0x14b1   :  { %3442 = vmatpush3.bf16.msra.mxu1 %v3439_v16 }
0x14b2   :  { %3444 = vmatprep.subr.bf16.mxu1 %v3443_v18 }
0x14b5   :  { %3446 = vmatpush3.bf16.msra.mxu1 %v3443_v18  ;;  %v2778_v18 = vrot.slane %v3909_v46, %v1434_v28 }
0x14b6   :  { %3448 = vmatprep.subr.bf16.mxu1 %v3447_v50 }
0x14b9   :  { %3450 = vmatpush3.bf16.msra.mxu1 %v3447_v50 }
0x157f   :  { %v2503_v23 = vpop.f32.mrb[26].mxu1 }
0x1580   :  { %v3322_v30 = vpop.f32.mrb[27].mxu1 }
0x1583   :  { %v2430_v13 = vpop.f32.mrb[26].mxu0 }
0x1584   :  { %v2504_v32 = vadd.f32 %v2503_v23, %v2430_v13  ;;  %v3315_v34 = vpop.f32.mrb[27].mxu0 }
0x1586   :  { %v2512_v29 = vadd.f32 %v2510_v5, %v2504_v32  ;;  %v2994_v5 = vld [vmem:[%s4114_s5 + $0x20] sm:$0xff] }
0x1588   :  { %v2514_v41 = vadd.f32 %v2512_v29, %v3898_v44  ;;  %v2544_v44 = vrot.slane %v3909_v46, %v1199_v35  ;;  %v2995_v35 = vld [vmem:[%s4114_s5 + $0x28] sm:$0xff] }
0x1589   :  { %v3427_v6 = vpack.c.bf16 %v2995_v35, %v2994_v5 }
0x158a   :  { %v2518_v40 = vsel %vm47_vm0, %v2514_v41, 0.0 }
0x158b   :  { %2519 = vadd.xlane.f32.xlu0 %v2518_v40  ;;  %3428 = vmatprep.subr.bf16.mxu0 %v3427_v6 }
0x158c   :  { %3430 = vmatpush3.bf16.msra.mxu0 %v3427_v6 }
0x158d   :  { %3432 = vmatprep.subr.bf16.mxu0 %v3431_v8 }
0x158f   :  { %2528 = vadd.xlane.f32.xlu0 %v2527_v52 }
0x1590   :  { %3434 = vmatpush3.bf16.msra.mxu0 %v3431_v8 }
0x1591   :  { %3353 = vmatprep.subr.mxu0 %v3566_v36 }
0x1618   :  { %v2520_v56 = vpop.xlane.xlu0 %2519 }
0x1619   :  { %v2522_v57 = vmul.f32 0.03125, %v2520_v56 }
0x161b   :  { %v2524_v58 = vsub.f32 %v2514_v41, %v2522_v57 }
0x161c   :  { %v2529_v39 = vpop.xlane.xlu0 %2528 }
0x161d   :  { %v2533_v59 = vmul.f32 0.03125, %v2529_v39  ;;  %v2526_v61 = vmul.f32 %v2524_v58, %v2524_v58 }
0x161f   :  { %v2535_v62 = vadd.f32 1e-12, %v2533_v59  ;;  %v2530_v63 = vsel %vm47_vm0, %v2526_v61, 0.0 }
0x1620   :  { %2531 = vadd.xlane.f32.xlu1 %v2530_v63 }
0x1621   :  { %3511 = vrsqrt.f32 %v2535_v62  ;;  %v2659_v62 = vrot.slane %v3909_v46, %v1314_v49 }
0x162b   :  { %v3512_v0 = vpop.eup %3511 }
0x162c   :  { %v2539_v1 = vmul.f32 %v3512_v0, %v2523_v37 }
0x162e   :  { %v2545_v3 = vmul.f32 %v2544_v44, %v2539_v1 }
0x1630   :  { %v4021_v4 = vadd.f32 %v2550_v2, %v2545_v3 }
0x1632   :  { %3331 = vmatprep.mubr.msk.f32.mxu0 %vm47_vm0, %v4021_v4 }
0x16ad   :  { %v2532_v33 = vpop.xlane.xlu1 %2531 }
0x16ae   :  { %v2534_v10 = vmul.f32 0.03125, %v2532_v33 }
0x16b0   :  { %v2536_v54 = vadd.f32 1e-12, %v2534_v10 }
0x16b2   :  { %3513 = vrsqrt.f32 %v2536_v54 }
0x16bc   :  { %v3514_v47 = vpop.eup %3513 }
0x16bd   :  { %v2540_v11 = vmul.f32 %v3514_v47, %v2524_v58 }
0x16bf   :  { %v2546_v12 = vmul.f32 %v2544_v44, %v2540_v11 }
0x16c1   :  { %v2552_v14 = vadd.f32 %v2550_v2, %v2546_v12 }
0x16c3   :  { %3332 = vmatmul.mubr.msk.f32.vlgmr.msra.gmra.mrb[28].mxu0 %vm47_vm0, %v2552_v14 }
0x16c4   :  { %3355 = vmatprep.mubr.msk.f32.mxu0 %vm3567_vm1, %v3566_v36 }
0x1796   :  { %v3333_v24 = vpop.f32.mrb[28].mxu0 }
0x1797   :  { %v2635_v25 = vadd.f32 %v3333_v24, %v2556_v22  ;;  %v2629_v26 = vpop.f32.mrb[29].mxu0 }
0x1798   :  { %v2630_v23 = vadd.f32 %v2629_v26, %v2556_v22  ;;  %v2781_v22 = vsel %vm3698_vm3, 1.0, %v3566_v36 }
0x1799   :  { %v2639_v30 = vmul.f32 %v2635_v25, %v2635_v25 }
0x179a   :  { %v2638_v31 = vmul.f32 %v2630_v23, %v2630_v23 }
0x179b   :  { %v2641_v13 = vmul.f32 %v2639_v30, %v2635_v25 }
0x179c   :  { %v2640_v32 = vmul.f32 %v2638_v31, %v2630_v23 }
0x179d   :  { %v2643_v34 = vmul.f32 0.044715, %v2641_v13 }
0x179e   :  { %v2642_v37 = vmul.f32 0.044715, %v2640_v32 }
0x179f   :  { %v2645_v29 = vadd.f32 %v2643_v34, %v2635_v25 }
0x17a0   :  { %v2644_v41 = vadd.f32 %v2642_v37, %v2630_v23 }
0x17a1   :  { %v2647_v40 = vmul.f32 0.7978846, %v2645_v29 }
0x17a2   :  { %v2646_v48 = vmul.f32 0.7978846, %v2644_v41 }
0x17a3   :  { %3515 = vtanh.f32 %v2647_v40 }
0x17a4   :  { %3517 = vtanh.f32 %v2646_v48 }
0x17ad   :  { %v3516_v52 = vpop.eup %3515 }
0x17ae   :  { %v3518_v56 = vpop.eup %3517  ;;  %v2651_v57 = vadd.f32 1.0, %v3516_v52 }
0x17af   :  { %v2650_v21 = vadd.f32 1.0, %v3518_v56 }
0x17b0   :  { %v2653_v58 = vmul.f32 0.5, %v2651_v57 }
0x17b1   :  { %v2652_v39 = vmul.f32 0.5, %v2650_v21 }
0x17b2   :  { %v2655_v61 = vmul.f32 %v2653_v58, %v2635_v25 }
0x17b3   :  { %v2654_v59 = vmul.f32 %v2652_v39, %v2630_v23 }
0x17b5   :  { %3350 = vmatprep.mubr.msk.f32.mxu1 %vm1316_vm6, %v2654_v59 }
0x17b6   :  { %3351 = vmatmul.mubr.msk.f32.vlgmr.msra.gmra.mrb[28].mxu1 %vm1316_vm6, %v2655_v61 }
0x1889   :  { %v3352_v63 = vpop.f32.mrb[28].mxu1 }
0x188a   :  { %v2738_v44 = vadd.f32 %v3352_v63, %v2659_v62  ;;  %v2732_v0 = vpop.f32.mrb[29].mxu1 }
0x188b   :  { %v2733_v1 = vadd.f32 %v2732_v0, %v2659_v62 }
0x188c   :  { %v2742_v2 = vadd.f32 %v2738_v44, %v2552_v14 }
0x188d   :  { %v2741_v3 = vadd.f32 %v2733_v1, %v4021_v4 }
0x188e   :  { %v2746_v5 = vsel %vm47_vm0, %v2742_v2, 0.0 }
0x188f   :  { %2747 = vadd.xlane.f32.xlu1 %v2746_v5  ;;  %v2743_v35 = vsel %vm47_vm0, %v2741_v3, 0.0 }
0x1890   :  { %2744 = vadd.xlane.f32.xlu0 %v2743_v35 }
0x191c   :  { %v2748_v6 = vpop.xlane.xlu1 %2747 }
0x191d   :  { %v2750_v55 = vmul.f32 0.03125, %v2748_v6  ;;  %v2745_v7 = vpop.xlane.xlu0 %2744 }
0x191e   :  { %v2749_v8 = vmul.f32 0.03125, %v2745_v7 }
0x191f   :  { %v2752_v33 = vsub.f32 %v2742_v2, %v2750_v55 }
0x1920   :  { %v2751_v10 = vsub.f32 %v2741_v3, %v2749_v8 }
0x1921   :  { %v2754_v49 = vmul.f32 %v2752_v33, %v2752_v33 }
0x1922   :  { %v2753_v54 = vmul.f32 %v2751_v10, %v2751_v10 }
0x1923   :  { %v2758_v47 = vsel %vm47_vm0, %v2754_v49, 0.0 }
0x1924   :  { %2759 = vadd.xlane.f32.xlu1 %v2758_v47  ;;  %v2755_v11 = vsel %vm47_vm0, %v2753_v54, 0.0 }
0x1925   :  { %2756 = vadd.xlane.f32.xlu0 %v2755_v11 }
0x19b1   :  { %v2760_v4 = vpop.xlane.xlu1 %2759 }
0x19b2   :  { %v2762_v12 = vmul.f32 0.03125, %v2760_v4  ;;  %v2757_v14 = vpop.xlane.xlu0 %2756 }
0x19b3   :  { %v2761_v9 = vmul.f32 0.03125, %v2757_v14 }
0x19b4   :  { %v2764_v60 = vadd.f32 1e-12, %v2762_v12 }
0x19b5   :  { %v2763_v53 = vadd.f32 1e-12, %v2761_v9 }
0x19b6   :  { %3519 = vrsqrt.f32 %v2764_v60 }
0x19b7   :  { %3521 = vrsqrt.f32 %v2763_v53 }
0x19b8   :  { %3523 = vrcp.f32 %v2936_v51 }
0x19b9   :  { %3525 = vrcp.f32 %v2857_v27 }
0x19c0   :  { %v3520_v42 = vpop.eup %3519 }
0x19c1   :  { %v3522_v16 = vpop.eup %3521  ;;  %v2768_v17 = vmul.f32 %v3520_v42, %v2752_v33 }
0x19c2   :  { %v2767_v43 = vmul.f32 %v3522_v16, %v2751_v10  ;;  %v3524_v25 = vpop.eup %3523 }
0x19c3   :  { %v2774_v20 = vmul.f32 %v2772_v15, %v2768_v17  ;;  %v3526_v26 = vpop.eup %3525 }
0x19c4   :  { %v2773_v19 = vmul.f32 %v2772_v15, %v2767_v43 }
0x19c5   :  { %v2780_v24 = vadd.f32 %v2778_v18, %v2774_v20 }
0x19c6   :  { %v2779_v50 = vadd.f32 %v2778_v18, %v2773_v19 }
0x19c8   :  { %3354 = vmatpush3.msra.mxu0 %v2779_v50 }
0x19c9   :  { %3356 = vmatmul.mubr.msk.f32.vlgmr.msra.gmra.mrb[30].mxu0 %vm283_vm4, %v2781_v22  ;;  %3358 = vmatprep.subr.mxu0 %v3566_v36 }
0x19ca   :  { %3359 = vmatpush3.msra.mxu0 %v2780_v24  ;;  %3360 = vmatprep.mubr.msk.f32.mxu0 %vm3567_vm1, %v3566_v36 }
0x19cd   :  { %3361 = vmatmul.mubr.msk.f32.vlgmr.msra.gmra.mrb[32].mxu0 %vm283_vm4, %v2860_v38 }
0x1a9c   :  { %v2851_v28 = vpop.f32.mrb[30].mxu0 }
0x1a9d   :  { %v3357_v46 = vpop.f32.mrb[31].mxu0  ;;  %v2859_v36 = vmul.f32 %v3526_v26, %v2851_v28 }
0x1aa0   :  { %v2930_v23 = vpop.f32.mrb[32].mxu0 }
0x1aa1   :  { %v2938_v30 = vmul.f32 %v3524_v25, %v2930_v23  ;;  %v3362_v31 = vpop.f32.mrb[33].mxu0 }
0x1aa3   :  { %v2940_v45 = vrot.slane %v2938_v30, 7 }
0x1aa5   :  { %v2943_v13 = vsel %vm2942_vm7, %v2859_v36, %v2940_v45 }
0x1aa6   :  { %2945 = vst.msk [vmem:[#allocation5] sm:$0x3] %vm2944_vm8, %v2943_v13 }
0x1aa7   :  { %3550 = shalt.err (!%p3547_p9)
}
0x1aa8   :  { %s3551_s18 = scalar_lea.hbm %s4117_s8, 32 }
0x1aa9   :  { %p3552_p10 = scmp.ne.s32.totalorder %s4117_s8, %s3551_s18  ;;  %p3555_p11 = scmp.lt.u32.totalorder %s3551_s18, %s4117_s8 }
0x1aab   :  { %p3557_p12 = pnand %p3555_p11, %p3552_p10 }
0x1aad   :  { %3560 = shalt.err (!%p3557_p12)
}
0x1aae   :  { %2955 = dma.vmem_to_hbm [thread:$0]  %s2953_s30, 32, %s4117_s8, [#allocation3]  }
0x1aaf   :  { %3563 = dma.done.wait [#allocation3], 32  }
0x1ab0   :  { %3564 = vsyncadd [#allocation3], 4294967264 }
0x1ab1   :  { %2959 = vsyncpa [#allocation3], 1 }
0x1ab2   :  { %2960 = vsyncpa [#allocation4], 1 }

</bundles_post_ra>
